<compile_context>
chip_gen: v7x
topology: tpu7x:2x2x1
jax: 0.10.0
libtpu: 0.0.40
codegen_flags: <defaults>
</compile_context>

<pallas_src>
import math

import jax
import jax.numpy as jnp
from jax import lax
from jax.experimental import pallas as pl
from jax.experimental.pallas import tpu as pltpu


# MXU-native operand dtype; accumulation is always f32 via preferred_element_type.
MATMUL_DTYPE = jnp.bfloat16


# ----------------------------------------------------------------------------
# In-kernel building blocks (operate on VMEM-resident values)
# ----------------------------------------------------------------------------
def _self_attention(h, wqkv, wo):
    """h: (Bb, L, D) f32; wqkv: (D, 3D) bf16 (softmax scale pre-folded into the
    Q columns); wo: (D, D) bf16.  Returns (h + attn_out, attention_weights)."""
    Bb, L, D = h.shape
    x2 = h.reshape(Bb * L, D).astype(MATMUL_DTYPE)
    qkv = jnp.dot(x2, wqkv, preferred_element_type=jnp.float32)        # (Bb*L, 3D)
    q = qkv[:, :D].reshape(Bb, L, D).astype(MATMUL_DTYPE)
    k = qkv[:, D:2 * D].reshape(Bb, L, D).astype(MATMUL_DTYPE)
    v = qkv[:, 2 * D:].reshape(Bb, L, D).astype(MATMUL_DTYPE)
    # scores: scale already folded into q, so no (L,L) multiply here
    s = jnp.einsum('bqd,bkd->bqk', q, k, preferred_element_type=jnp.float32)
    m = jnp.max(s, axis=-1, keepdims=True)
    p = jnp.exp(s - m)
    inv = pl.reciprocal(jnp.sum(p, axis=-1, keepdims=True), approx=True)  # EUP
    a = p * inv                                                        # (Bb, L, L)
    ctx = jnp.einsum('bqk,bkd->bqd', a.astype(MATMUL_DTYPE), v,
                     preferred_element_type=jnp.float32)
    o = jnp.dot(ctx.reshape(Bb * L, D).astype(MATMUL_DTYPE), wo,
                preferred_element_type=jnp.float32).reshape(Bb, L, D)
    return h + o, a


def _conv_elu_pool(x, w0, w1, w2, bias):
    """x: (Bb, L, D) f32 channels-last; w0/w1/w2: (D, D) bf16 taps for x[l-1],
    x[l], x[l+1]; bias: (1, D) f32.
    Conv1d(k=3, pad=1) -> ELU -> MaxPool1d(k=3, stride=2, pad=1).  Even L."""
    Bb, L, D = x.shape
    Lo = L // 2
    zero = jnp.zeros((Bb, 1, D), jnp.float32)
    x_prev = jnp.concatenate([zero, x[:, :L - 1, :]], axis=1)   # x[l-1], zero pad
    x_next = jnp.concatenate([x[:, 1:, :], zero], axis=1)       # x[l+1], zero pad

    def proj(t, w):   # 2-D MXU matmul over flattened (Bb*L, D)
        return jnp.dot(t.reshape(Bb * L, D).astype(MATMUL_DTYPE), w,
                       preferred_element_type=jnp.float32)

    y = (proj(x_prev, w0) + proj(x, w1) + proj(x_next, w2)).reshape(Bb, L, D) + bias
    # ELU (alpha=1); clamp before exp so large positives never hit the exp.
    y = jnp.where(y > 0, y, jnp.exp(jnp.minimum(y, 0.0)) - 1.0)
    # MaxPool1d(k=3, s=2, p=1): out[i] = max(y[2i-1], y[2i], y[2i+1]).
    # Reshape once and take the 3-way max over (Lo, 2, D) windows (half the
    # elementwise max work of shifting at full L).
    yr = y.reshape(Bb, Lo, 2, D)
    even = yr[:, :, 0, :]                                        # y[2i]
    odd = yr[:, :, 1, :]                                         # y[2i+1]
    neg = jnp.full((Bb, 1, D), -jnp.inf, jnp.float32)
    odd_prev = jnp.concatenate([neg, odd[:, :Lo - 1, :]], axis=1)  # y[2i-1]
    return jnp.maximum(jnp.maximum(even, odd), odd_prev)


def _layer_norm(x, gamma, beta, eps):
    mean = jnp.mean(x, axis=-1, keepdims=True)
    xc = x - mean
    var = jnp.mean(xc * xc, axis=-1, keepdims=True)
    return xc * lax.rsqrt(var + eps) * gamma + beta


# ----------------------------------------------------------------------------
# One-time parameter preparation (hoisted out of the forward path)
# ----------------------------------------------------------------------------
def prepare_encoder_params(attn_params, conv_params, norm_params):
    """Cast / fuse / reshape parameters once.  attn: (wq,wk,wv,wo) f32 (D,D);
    conv: (w0,w1,w2,bias); norm: (gamma,beta)."""
    D = attn_params[0][0].shape[0]
    scale = 1.0 / math.sqrt(D)
    attn_prepped = []
    for (wq, wk, wv, wo) in attn_params:
        # Q|K|V fused along the output dim; softmax scale folded into Q columns.
        wqkv = jnp.concatenate([wq * scale, wk, wv], axis=1).astype(MATMUL_DTYPE)
        attn_prepped.append((wqkv, wo.astype(MATMUL_DTYPE)))
    conv_prepped = []
    for (w0, w1, w2, bias) in conv_params:
        conv_prepped.append((w0.astype(MATMUL_DTYPE), w1.astype(MATMUL_DTYPE),
                             w2.astype(MATMUL_DTYPE),
                             jnp.asarray(bias, jnp.float32).reshape(1, D)))
    gamma, beta = norm_params
    norm_prepped = (jnp.asarray(gamma, jnp.float32).reshape(1, D),
                    jnp.asarray(beta, jnp.float32).reshape(1, D))
    return attn_prepped, conv_prepped, norm_prepped


def _pick_batch_block(B):
    """Largest divisor of B that still leaves >= 2 grid steps (v7x megacore)."""
    best = 1
    for cand in range(1, B // 2 + 1):
        if B % cand == 0:
            best = cand
    return best


def _vmem_estimate_bytes(bblk, seq, D, n_attn, n_conv, collect_attentions):
    f32, b16 = 4, 2
    L0, Lo = seq[0], seq[-1]
    io = 2 * bblk * L0 * D * f32 + 2 * bblk * Lo * D * f32        # double-buffered IO
    if collect_attentions:
        io += 2 * sum(bblk * s * s * b16 for s in seq)
    w = 2 * (n_attn * 4 * D * D * b16
             + n_conv * (3 * D * D * b16 + D * f32)
             + 2 * D * f32)                                       # resident weights
    inter = 6 * bblk * L0 * L0 * f32 + 8 * bblk * L0 * 3 * D * f32  # live f32 temps
    return io + w + inter


# ----------------------------------------------------------------------------
# Fused Encoder forward: one pallas_call for attn -> conv -> ... -> attn -> norm
# ----------------------------------------------------------------------------
def encoder_forward(x, attn_prepped, conv_prepped, norm_prepped, *,
                    attention_mask=None, eps=1e-5, collect_attentions=True,
                    attn_dtype=jnp.bfloat16, batch_block=None):
    # TODO(synk): only the attention_mask=None path of the PyTorch module is
    # implemented; an additive mask would be one extra (L, L) kernel input.
    assert attention_mask is None
    B, L, D = x.shape
    n_attn = len(attn_prepped)
    n_conv = len(conv_prepped)
    assert n_conv == n_attn - 1, "Encoder expects len(conv_layers)=len(attn)-1"

    # sequence length seen by each attention layer (each conv/pool halves it)
    seq = [L]
    for _ in range(n_conv):
        assert seq[-1] % 2 == 0, "conv/pool path assumes an even sequence length"
        seq.append(seq[-1] // 2)
    Lo = seq[-1]

    bblk = batch_block if batch_block is not None else _pick_batch_block(B)
    assert B % bblk == 0, "batch_block must divide the batch size"
    gamma, beta = norm_prepped

    # ---- flat inputs (already prepared; no per-call casts/concats here) ----
    flat_inputs = [x]
    for (wqkv, wo) in attn_prepped:
        flat_inputs += [wqkv, wo]
    for (w0, w1, w2, bias) in conv_prepped:
        flat_inputs += [w0, w1, w2, bias]
    flat_inputs += [gamma, beta]

    def kernel(*refs):
        it = iter(refs)
        x_ref = next(it)
        attn_w = [(next(it), next(it)) for _ in range(n_attn)]
        conv_w = [(next(it), next(it), next(it), next(it)) for _ in range(n_conv)]
        g_ref = next(it)
        b_ref = next(it)
        y_ref = next(it)
        a_refs = [next(it) for _ in range(n_attn)] if collect_attentions else []

        h = x_ref[...].astype(jnp.float32)                     # (bblk, L, D)
        for i in range(n_attn):
            wqkv, wo = attn_w[i]
            h, a = _self_attention(h, wqkv[...], wo[...])
            if collect_attentions:
                a_refs[i][...] = a.astype(a_refs[i].dtype)     # bf16 writeback
            if i < n_conv:
                w0, w1, w2, bias = conv_w[i]
                h = _conv_elu_pool(h, w0[...], w1[...], w2[...], bias[...])
        y_ref[...] = _layer_norm(h, g_ref[...], b_ref[...], eps).astype(y_ref.dtype)

    def _const_spec(shape):
        n = len(shape)
        return pl.BlockSpec(shape, lambda b: (0,) * n)

    in_specs = [pl.BlockSpec((bblk, L, D), lambda b: (b, 0, 0))]
    for (wqkv, wo) in attn_prepped:
        in_specs += [_const_spec(wqkv.shape), _const_spec(wo.shape)]
    for (w0, w1, w2, bias) in conv_prepped:
        in_specs += [_const_spec(w0.shape), _const_spec(w1.shape),
                     _const_spec(w2.shape), _const_spec(bias.shape)]
    in_specs += [_const_spec(gamma.shape), _const_spec(beta.shape)]

    out_shapes = [jax.ShapeDtypeStruct((B, Lo, D), x.dtype)]
    out_specs = [pl.BlockSpec((bblk, Lo, D), lambda b: (b, 0, 0))]
    if collect_attentions:
        for s in seq:
            out_shapes.append(jax.ShapeDtypeStruct((B, s, s), attn_dtype))
            out_specs.append(pl.BlockSpec((bblk, s, s), lambda b: (b, 0, 0)))

    est = _vmem_estimate_bytes(bblk, seq, D, n_attn, n_conv, collect_attentions)
    vmem_limit = int(min(max(2 * est, 16 * 2**20), 64 * 2**20))

    outs = pl.pallas_call(
        kernel,
        out_shape=tuple(out_shapes),
        grid=(B // bblk,),
        in_specs=in_specs,
        out_specs=tuple(out_specs),
        compiler_params=pltpu.CompilerParams(
            dimension_semantics=("parallel",),      # v7x: batch blocks across TCs
            vmem_limit_bytes=vmem_limit),
    )(*flat_inputs)

    y = outs[0]
    attentions = list(outs[1:]) if collect_attentions else []
    return y, attentions


# ----------------------------------------------------------------------------
# Pure-JAX reference (f32 everywhere) for a correctness check
# ----------------------------------------------------------------------------
def _reference_forward(x, attn_params, conv_params, norm_params, eps=1e-5):
    D = x.shape[-1]
    scale = 1.0 / math.sqrt(D)

    def attn(x, wq, wk, wv, wo):
        q, k, v = x @ wq, x @ wk, x @ wv
        s = jnp.einsum('bqd,bkd->bqk', q, k) * scale
        a = jax.nn.softmax(s, axis=-1)
        return x + jnp.einsum('bqk,bkd->bqd', a, v) @ wo, a

    def conv(x, w0, w1, w2, bias):
        B, L, _ = x.shape
        zero = jnp.zeros((B, 1, D), x.dtype)
        x_prev = jnp.concatenate([zero, x[:, :-1]], axis=1)
        x_next = jnp.concatenate([x[:, 1:], zero], axis=1)
        y = x_prev @ w0 + x @ w1 + x_next @ w2 + bias
        y = jnp.where(y > 0, y, jnp.exp(jnp.minimum(y, 0.0)) - 1.0)
        neg = jnp.full((B, 1, D), -jnp.inf, y.dtype)
        y_prev = jnp.concatenate([neg, y[:, :-1]], axis=1)
        y_next = jnp.concatenate([y[:, 1:], neg], axis=1)
        m = jnp.maximum(jnp.maximum(y_prev, y), y_next)
        return m[:, ::2]

    attns = []
    for i, cp in enumerate(conv_params):
        x, a = attn(x, *attn_params[i]); attns.append(a)
        x = conv(x, *cp)
    x, a = attn(x, *attn_params[-1]); attns.append(a)
    gamma, beta = norm_params
    mean = x.mean(-1, keepdims=True)
    var = ((x - mean) ** 2).mean(-1, keepdims=True)
    x = (x - mean) / jnp.sqrt(var + eps) * gamma + beta
    return x, attns


# ----------------------------------------------------------------------------
# Deterministic parameter construction + driver
# ----------------------------------------------------------------------------
def make_params(key, D, n_attn, n_conv):
    keys = iter(jax.random.split(key, 4 * n_attn + 3 * n_conv + 2))
    attn_params = []
    for _ in range(n_attn):
        attn_params.append(tuple(
            (jax.random.normal(next(keys), (D, D), jnp.float32) * 0.05)
            for _ in range(4)))
    conv_params = []
    for _ in range(n_conv):
        w0 = jax.random.normal(next(keys), (D, D), jnp.float32) * 0.05
        w1 = jax.random.normal(next(keys), (D, D), jnp.float32) * 0.05
        w2 = jax.random.normal(next(keys), (D, D), jnp.float32) * 0.05
        bias = jnp.zeros((1, D), jnp.float32)
        conv_params.append((w0, w1, w2, bias))
    gamma = jnp.ones((1, D), jnp.float32)
    beta = jnp.zeros((1, D), jnp.float32)
    return attn_params, conv_params, (gamma, beta)


if __name__ == "__main__":
    B, L, D = 2, 16, 32
    key = jax.random.PRNGKey(0)
    k_x, k_p = jax.random.split(key)
    x = jax.random.normal(k_x, (B, L, D), jnp.float32)

    attn_params, conv_params, norm_params = make_params(k_p, D, n_attn=2, n_conv=1)

    # One-time parameter prep (bf16 casts, QKV fusion, scale folding) — off the
    # per-call forward path.
    prepped = prepare_encoder_params(attn_params, conv_params, norm_params)
    prepped = jax.block_until_ready(prepped)

    # Full path: output + attention weights (bf16 writeback).
    y, attentions = encoder_forward(x, *prepped)
    jax.block_until_ready(y)
    for a in attentions:
        jax.block_until_ready(a)

    assert y.shape == (B, L // 2, D), y.shape
    assert attentions[0].shape == (B, L, L)
    assert attentions[1].shape == (B, L // 2, L // 2)
    assert attentions[0].dtype == jnp.bfloat16

    # correctness vs. pure-JAX f32 reference (tolerance covers bf16 operands and
    # bf16-stored attention weights)
    y_ref, attns_ref = _reference_forward(x, attn_params, conv_params, norm_params)
    err_y = float(jnp.max(jnp.abs(y - y_ref)))
    assert err_y < 0.1, err_y
    for a, ar in zip(attentions, attns_ref):
        err_a = float(jnp.max(jnp.abs(a.astype(jnp.float32) - ar)))
        assert err_a < 0.05, err_a

    # Fast path: no attention-weight writeback (dominant HBM traffic removed).
    y_fast, attns_fast = encoder_forward(x, *prepped, collect_attentions=False)
    jax.block_until_ready(y_fast)
    assert attns_fast == []
    assert float(jnp.max(jnp.abs(y_fast - y_ref))) < 0.1

    print("KERNEL_OK")
</pallas_src>

<mosaic_0001>
module attributes {stable_mosaic.version = 11 : i64} {
  func.func @kernel(%arg0: i32, %arg1: memref<1x16x32xf32, #tpu.memory_space<vmem>>, %arg2: memref<32x96xbf16, #tpu.memory_space<vmem>>, %arg3: memref<32x32xbf16, #tpu.memory_space<vmem>>, %arg4: memref<32x96xbf16, #tpu.memory_space<vmem>>, %arg5: memref<32x32xbf16, #tpu.memory_space<vmem>>, %arg6: memref<32x32xbf16, #tpu.memory_space<vmem>>, %arg7: memref<32x32xbf16, #tpu.memory_space<vmem>>, %arg8: memref<32x32xbf16, #tpu.memory_space<vmem>>, %arg9: memref<1x32xf32, #tpu.memory_space<vmem>>, %arg10: memref<1x32xf32, #tpu.memory_space<vmem>>, %arg11: memref<1x32xf32, #tpu.memory_space<vmem>>, %arg12: memref<1x8x32xf32, #tpu.memory_space<vmem>>, %arg13: memref<1x16x16xbf16, #tpu.memory_space<vmem>>, %arg14: memref<1x8x8xbf16, #tpu.memory_space<vmem>>) attributes {dimension_semantics = [#tpu.dimension_semantics<parallel>], iteration_bounds = array<i64: 2>, scalar_prefetch = 0 : i64, scratch_operands = 0 : i64, tpu.core_type = #tpu.core_type<tc>, window_params = [{transform_indices = @transform_0, window_bounds = array<i64: 1, 16, 32>}, {pipeline_mode = #tpu.pipeline_mode<synchronous>, transform_indices = @transform_1, window_bounds = array<i64: 32, 96>}, {pipeline_mode = #tpu.pipeline_mode<synchronous>, transform_indices = @transform_2, window_bounds = array<i64: 32, 32>}, {pipeline_mode = #tpu.pipeline_mode<synchronous>, transform_indices = @transform_3, window_bounds = array<i64: 32, 96>}, {pipeline_mode = #tpu.pipeline_mode<synchronous>, transform_indices = @transform_4, window_bounds = array<i64: 32, 32>}, {pipeline_mode = #tpu.pipeline_mode<synchronous>, transform_indices = @transform_5, window_bounds = array<i64: 32, 32>}, {pipeline_mode = #tpu.pipeline_mode<synchronous>, transform_indices = @transform_6, window_bounds = array<i64: 32, 32>}, {pipeline_mode = #tpu.pipeline_mode<synchronous>, transform_indices = @transform_7, window_bounds = array<i64: 32, 32>}, {pipeline_mode = #tpu.pipeline_mode<synchronous>, transform_indices = @transform_8, window_bounds = array<i64: 1, 32>}, {pipeline_mode = #tpu.pipeline_mode<synchronous>, transform_indices = @transform_9, window_bounds = array<i64: 1, 32>}, {pipeline_mode = #tpu.pipeline_mode<synchronous>, transform_indices = @transform_10, window_bounds = array<i64: 1, 32>}, {transform_indices = @transform_11, window_bounds = array<i64: 1, 8, 32>}, {transform_indices = @transform_12, window_bounds = array<i64: 1, 16, 16>}, {transform_indices = @transform_13, window_bounds = array<i64: 1, 8, 8>}]} {
    %c0 = arith.constant 0 : index
    %c0_0 = arith.constant 0 : index
    %c0_1 = arith.constant 0 : index
    %0 = vector.load %arg1[%c0, %c0_0, %c0_1] : memref<1x16x32xf32, #tpu.memory_space<vmem>>, vector<1x16x32xf32>
    %c0_2 = arith.constant 0 : index
    %c0_3 = arith.constant 0 : index
    %1 = vector.load %arg2[%c0_2, %c0_3] : memref<32x96xbf16, #tpu.memory_space<vmem>>, vector<32x96xbf16>
    %c0_4 = arith.constant 0 : index
    %c0_5 = arith.constant 0 : index
    %2 = vector.load %arg3[%c0_4, %c0_5] : memref<32x32xbf16, #tpu.memory_space<vmem>>, vector<32x32xbf16>
    %3 = vector.shape_cast %0 : vector<1x16x32xf32> to vector<16x32xf32>
    %4 = arith.truncf %3 : vector<16x32xf32> to vector<16x32xbf16>
    %cst = arith.constant dense<0.000000e+00> : vector<16x96xf32>
    %5 = tpu.matmul %4, %1, %cst {dimension_numbers = #tpu.dot_dimension_numbers<[1], [0], [0], [1], [0, 0, 1, 1], [], []>} : vector<16x32xbf16>, vector<32x96xbf16>, vector<16x96xf32> -> vector<16x96xf32>
    %6 = vector.extract_strided_slice %5 {offsets = [0, 0], sizes = [16, 32], strides = [1, 1]} : vector<16x96xf32> to vector<16x32xf32>
    %7 = vector.shape_cast %6 : vector<16x32xf32> to vector<1x16x32xf32>
    %8 = arith.truncf %7 : vector<1x16x32xf32> to vector<1x16x32xbf16>
    %9 = vector.extract_strided_slice %5 {offsets = [0, 32], sizes = [16, 32], strides = [1, 1]} : vector<16x96xf32> to vector<16x32xf32>
    %10 = vector.shape_cast %9 : vector<16x32xf32> to vector<1x16x32xf32>
    %11 = arith.truncf %10 : vector<1x16x32xf32> to vector<1x16x32xbf16>
    %12 = vector.extract_strided_slice %5 {offsets = [0, 64], sizes = [16, 32], strides = [1, 1]} : vector<16x96xf32> to vector<16x32xf32>
    %13 = vector.shape_cast %12 : vector<16x32xf32> to vector<1x16x32xf32>
    %14 = arith.truncf %13 : vector<1x16x32xf32> to vector<1x16x32xbf16>
    "tpu.trace_start"() <{level = 10 : i32, message = "bqd,bkd->bqk"}> : () -> ()
    %cst_6 = arith.constant dense<0.000000e+00> : vector<1x16x16xf32>
    %15 = tpu.matmul %8, %11, %cst_6 {dimension_numbers = #tpu.dot_dimension_numbers<[2], [2], [1], [1], [0, 0, 0, 1, 1, 1], [0], [0]>} : vector<1x16x32xbf16>, vector<1x16x32xbf16>, vector<1x16x16xf32> -> vector<1x16x16xf32>
    "tpu.trace_stop"() : () -> ()
    %cst_7 = arith.constant dense<0xFF800000> : vector<1x16xf32>
    %16 = vector.multi_reduction <maximumf>, %15, %cst_7 [2] : vector<1x16x16xf32> to vector<1x16xf32>
    %17 = vector.shape_cast %16 : vector<1x16xf32> to vector<1x16x1xf32>
    %18 = vector.broadcast %17 : vector<1x16x1xf32> to vector<1x16x16xf32>
    %19 = arith.subf %15, %18 : vector<1x16x16xf32>
    %20 = math.exp %19 : vector<1x16x16xf32>
    %cst_8 = arith.constant dense<0.000000e+00> : vector<1x16xf32>
    %21 = vector.multi_reduction <add>, %20, %cst_8 [2] : vector<1x16x16xf32> to vector<1x16xf32>
    %22 = vector.shape_cast %21 : vector<1x16xf32> to vector<1x16x1xf32>
    %23 = tpu.reciprocal %22 {approx = true} : vector<1x16x1xf32> -> vector<1x16x1xf32>
    %24 = vector.broadcast %23 : vector<1x16x1xf32> to vector<1x16x16xf32>
    %25 = arith.mulf %20, %24 : vector<1x16x16xf32>
    %26 = arith.truncf %25 : vector<1x16x16xf32> to vector<1x16x16xbf16>
    "tpu.trace_start"() <{level = 10 : i32, message = "bqk,bkd->bqd"}> : () -> ()
    %cst_9 = arith.constant dense<0.000000e+00> : vector<1x16x32xf32>
    %27 = tpu.matmul %26, %14, %cst_9 {dimension_numbers = #tpu.dot_dimension_numbers<[2], [1], [1], [2], [0, 0, 0, 1, 1, 2], [0], [0]>} : vector<1x16x16xbf16>, vector<1x16x32xbf16>, vector<1x16x32xf32> -> vector<1x16x32xf32>
    "tpu.trace_stop"() : () -> ()
    %28 = vector.shape_cast %27 : vector<1x16x32xf32> to vector<16x32xf32>
    %29 = arith.truncf %28 : vector<16x32xf32> to vector<16x32xbf16>
    %cst_10 = arith.constant dense<0.000000e+00> : vector<16x32xf32>
    %30 = tpu.matmul %29, %2, %cst_10 {dimension_numbers = #tpu.dot_dimension_numbers<[1], [0], [0], [1], [0, 0, 1, 1], [], []>} : vector<16x32xbf16>, vector<32x32xbf16>, vector<16x32xf32> -> vector<16x32xf32>
    %31 = vector.shape_cast %30 : vector<16x32xf32> to vector<1x16x32xf32>
    %32 = arith.addf %0, %31 : vector<1x16x32xf32>
    %33 = arith.truncf %25 : vector<1x16x16xf32> to vector<1x16x16xbf16>
    %c0_11 = arith.constant 0 : index
    %c0_12 = arith.constant 0 : index
    %c0_13 = arith.constant 0 : index
    %34 = vector.load %arg13[%c0_11, %c0_12, %c0_13] : memref<1x16x16xbf16, #tpu.memory_space<vmem>>, vector<1x16x16xbf16>
    tpu.vector_store %arg13[%c0_11, %c0_12, %c0_13], %33 {strides = array<i32>} : memref<1x16x16xbf16, #tpu.memory_space<vmem>>, vector<1x16x16xbf16>,
    %c0_14 = arith.constant 0 : index
    %c0_15 = arith.constant 0 : index
    %35 = vector.load %arg6[%c0_14, %c0_15] : memref<32x32xbf16, #tpu.memory_space<vmem>>, vector<32x32xbf16>
    %c0_16 = arith.constant 0 : index
    %c0_17 = arith.constant 0 : index
    %36 = vector.load %arg7[%c0_16, %c0_17] : memref<32x32xbf16, #tpu.memory_space<vmem>>, vector<32x32xbf16>
    %c0_18 = arith.constant 0 : index
    %c0_19 = arith.constant 0 : index
    %37 = vector.load %arg8[%c0_18, %c0_19] : memref<32x32xbf16, #tpu.memory_space<vmem>>, vector<32x32xbf16>
    %c0_20 = arith.constant 0 : index
    %c0_21 = arith.constant 0 : index
    %38 = vector.load %arg9[%c0_20, %c0_21] : memref<1x32xf32, #tpu.memory_space<vmem>>, vector<1x32xf32>
    %cst_22 = arith.constant 0.000000e+00 : f32
    %39 = vector.broadcast %cst_22 : f32 to vector<1x1x32xf32>
    %40 = vector.extract_strided_slice %32 {offsets = [0, 0, 0], sizes = [1, 15, 32], strides = [1, 1, 1]} : vector<1x16x32xf32> to vector<1x15x32xf32>
    %41 = tpu.concatenate %39, %40 in 1 : vector<1x1x32xf32>, vector<1x15x32xf32> -> vector<1x16x32xf32>
    %42 = vector.extract_strided_slice %32 {offsets = [0, 1, 0], sizes = [1, 15, 32], strides = [1, 1, 1]} : vector<1x16x32xf32> to vector<1x15x32xf32>
    %43 = tpu.concatenate %42, %39 in 1 : vector<1x15x32xf32>, vector<1x1x32xf32> -> vector<1x16x32xf32>
    %44 = vector.shape_cast %41 : vector<1x16x32xf32> to vector<16x32xf32>
    %45 = arith.truncf %44 : vector<16x32xf32> to vector<16x32xbf16>
    %cst_23 = arith.constant dense<0.000000e+00> : vector<16x32xf32>
    %46 = tpu.matmul %45, %35, %cst_23 {dimension_numbers = #tpu.dot_dimension_numbers<[1], [0], [0], [1], [0, 0, 1, 1], [], []>} : vector<16x32xbf16>, vector<32x32xbf16>, vector<16x32xf32> -> vector<16x32xf32>
    %47 = vector.shape_cast %32 : vector<1x16x32xf32> to vector<16x32xf32>
    %48 = arith.truncf %47 : vector<16x32xf32> to vector<16x32xbf16>
    %cst_24 = arith.constant dense<0.000000e+00> : vector<16x32xf32>
    %49 = tpu.matmul %48, %36, %cst_24 {dimension_numbers = #tpu.dot_dimension_numbers<[1], [0], [0], [1], [0, 0, 1, 1], [], []>} : vector<16x32xbf16>, vector<32x32xbf16>, vector<16x32xf32> -> vector<16x32xf32>
    %50 = arith.addf %46, %49 : vector<16x32xf32>
    %51 = vector.shape_cast %43 : vector<1x16x32xf32> to vector<16x32xf32>
    %52 = arith.truncf %51 : vector<16x32xf32> to vector<16x32xbf16>
    %cst_25 = arith.constant dense<0.000000e+00> : vector<16x32xf32>
    %53 = tpu.matmul %52, %37, %cst_25 {dimension_numbers = #tpu.dot_dimension_numbers<[1], [0], [0], [1], [0, 0, 1, 1], [], []>} : vector<16x32xbf16>, vector<32x32xbf16>, vector<16x32xf32> -> vector<16x32xf32>
    %54 = arith.addf %50, %53 : vector<16x32xf32>
    %55 = vector.shape_cast %54 : vector<16x32xf32> to vector<1x16x32xf32>
    %56 = vector.shape_cast %38 : vector<1x32xf32> to vector<1x1x32xf32>
    %57 = vector.broadcast %56 : vector<1x1x32xf32> to vector<1x16x32xf32>
    %58 = arith.addf %55, %57 : vector<1x16x32xf32>
    %cst_26 = arith.constant 0.000000e+00 : f32
    %59 = vector.broadcast %cst_26 : f32 to vector<1x16x32xf32>
    %60 = arith.cmpf ogt, %58, %59 : vector<1x16x32xf32>
    %cst_27 = arith.constant 0.000000e+00 : f32
    %61 = vector.broadcast %cst_27 : f32 to vector<1x16x32xf32>
    %62 = arith.minimumf %58, %61 : vector<1x16x32xf32>
    %63 = math.exp %62 : vector<1x16x32xf32>
    %cst_28 = arith.constant 1.000000e+00 : f32
    %64 = vector.broadcast %cst_28 : f32 to vector<1x16x32xf32>
    %65 = arith.subf %63, %64 : vector<1x16x32xf32>
    %66 = arith.select %60, %58, %65 : vector<1x16x32xi1>, vector<1x16x32xf32>
    %67 = vector.shape_cast %66 : vector<1x16x32xf32> to vector<1x8x2x32xf32>
    %68 = vector.extract_strided_slice %67 {offsets = [0, 0, 0, 0], sizes = [1, 8, 1, 32], strides = [1, 1, 1, 1]} : vector<1x8x2x32xf32> to vector<1x8x1x32xf32>
    %69 = vector.shape_cast %68 : vector<1x8x1x32xf32> to vector<1x8x32xf32>
    %70 = vector.extract_strided_slice %67 {offsets = [0, 0, 1, 0], sizes = [1, 8, 1, 32], strides = [1, 1, 1, 1]} : vector<1x8x2x32xf32> to vector<1x8x1x32xf32>
    %71 = vector.shape_cast %70 : vector<1x8x1x32xf32> to vector<1x8x32xf32>
    %cst_29 = arith.constant 0xFF800000 : f32
    %72 = vector.broadcast %cst_29 : f32 to vector<1x1x32xf32>
    %73 = vector.extract_strided_slice %71 {offsets = [0, 0, 0], sizes = [1, 7, 32], strides = [1, 1, 1]} : vector<1x8x32xf32> to vector<1x7x32xf32>
    %74 = tpu.concatenate %72, %73 in 1 : vector<1x1x32xf32>, vector<1x7x32xf32> -> vector<1x8x32xf32>
    %75 = arith.maximumf %69, %71 : vector<1x8x32xf32>
    %76 = arith.maximumf %75, %74 : vector<1x8x32xf32>
    %c0_30 = arith.constant 0 : index
    %c0_31 = arith.constant 0 : index
    %77 = vector.load %arg4[%c0_30, %c0_31] : memref<32x96xbf16, #tpu.memory_space<vmem>>, vector<32x96xbf16>
    %c0_32 = arith.constant 0 : index
    %c0_33 = arith.constant 0 : index
    %78 = vector.load %arg5[%c0_32, %c0_33] : memref<32x32xbf16, #tpu.memory_space<vmem>>, vector<32x32xbf16>
    %79 = vector.shape_cast %76 : vector<1x8x32xf32> to vector<8x32xf32>
    %80 = arith.truncf %79 : vector<8x32xf32> to vector<8x32xbf16>
    %cst_34 = arith.constant dense<0.000000e+00> : vector<8x96xf32>
    %81 = tpu.matmul %80, %77, %cst_34 {dimension_numbers = #tpu.dot_dimension_numbers<[1], [0], [0], [1], [0, 0, 1, 1], [], []>} : vector<8x32xbf16>, vector<32x96xbf16>, vector<8x96xf32> -> vector<8x96xf32>
    %82 = vector.extract_strided_slice %81 {offsets = [0, 0], sizes = [8, 32], strides = [1, 1]} : vector<8x96xf32> to vector<8x32xf32>
    %83 = vector.shape_cast %82 : vector<8x32xf32> to vector<1x8x32xf32>
    %84 = arith.truncf %83 : vector<1x8x32xf32> to vector<1x8x32xbf16>
    %85 = vector.extract_strided_slice %81 {offsets = [0, 32], sizes = [8, 32], strides = [1, 1]} : vector<8x96xf32> to vector<8x32xf32>
    %86 = vector.shape_cast %85 : vector<8x32xf32> to vector<1x8x32xf32>
    %87 = arith.truncf %86 : vector<1x8x32xf32> to vector<1x8x32xbf16>
    %88 = vector.extract_strided_slice %81 {offsets = [0, 64], sizes = [8, 32], strides = [1, 1]} : vector<8x96xf32> to vector<8x32xf32>
    %89 = vector.shape_cast %88 : vector<8x32xf32> to vector<1x8x32xf32>
    %90 = arith.truncf %89 : vector<1x8x32xf32> to vector<1x8x32xbf16>
    "tpu.trace_start"() <{level = 10 : i32, message = "bqd,bkd->bqk"}> : () -> ()
    %cst_35 = arith.constant dense<0.000000e+00> : vector<1x8x8xf32>
    %91 = tpu.matmul %84, %87, %cst_35 {dimension_numbers = #tpu.dot_dimension_numbers<[2], [2], [1], [1], [0, 0, 0, 1, 1, 1], [0], [0]>} : vector<1x8x32xbf16>, vector<1x8x32xbf16>, vector<1x8x8xf32> -> vector<1x8x8xf32>
    "tpu.trace_stop"() : () -> ()
    %cst_36 = arith.constant dense<0xFF800000> : vector<1x8xf32>
    %92 = vector.multi_reduction <maximumf>, %91, %cst_36 [2] : vector<1x8x8xf32> to vector<1x8xf32>
    %93 = vector.shape_cast %92 : vector<1x8xf32> to vector<1x8x1xf32>
    %94 = vector.broadcast %93 : vector<1x8x1xf32> to vector<1x8x8xf32>
    %95 = arith.subf %91, %94 : vector<1x8x8xf32>
    %96 = math.exp %95 : vector<1x8x8xf32>
    %cst_37 = arith.constant dense<0.000000e+00> : vector<1x8xf32>
    %97 = vector.multi_reduction <add>, %96, %cst_37 [2] : vector<1x8x8xf32> to vector<1x8xf32>
    %98 = vector.shape_cast %97 : vector<1x8xf32> to vector<1x8x1xf32>
    %99 = tpu.reciprocal %98 {approx = true} : vector<1x8x1xf32> -> vector<1x8x1xf32>
    %100 = vector.broadcast %99 : vector<1x8x1xf32> to vector<1x8x8xf32>
    %101 = arith.mulf %96, %100 : vector<1x8x8xf32>
    %102 = arith.truncf %101 : vector<1x8x8xf32> to vector<1x8x8xbf16>
    "tpu.trace_start"() <{level = 10 : i32, message = "bqk,bkd->bqd"}> : () -> ()
    %cst_38 = arith.constant dense<0.000000e+00> : vector<1x8x32xf32>
    %103 = tpu.matmul %102, %90, %cst_38 {dimension_numbers = #tpu.dot_dimension_numbers<[2], [1], [1], [2], [0, 0, 0, 1, 1, 2], [0], [0]>} : vector<1x8x8xbf16>, vector<1x8x32xbf16>, vector<1x8x32xf32> -> vector<1x8x32xf32>
    "tpu.trace_stop"() : () -> ()
    %104 = vector.shape_cast %103 : vector<1x8x32xf32> to vector<8x32xf32>
    %105 = arith.truncf %104 : vector<8x32xf32> to vector<8x32xbf16>
    %cst_39 = arith.constant dense<0.000000e+00> : vector<8x32xf32>
    %106 = tpu.matmul %105, %78, %cst_39 {dimension_numbers = #tpu.dot_dimension_numbers<[1], [0], [0], [1], [0, 0, 1, 1], [], []>} : vector<8x32xbf16>, vector<32x32xbf16>, vector<8x32xf32> -> vector<8x32xf32>
    %107 = vector.shape_cast %106 : vector<8x32xf32> to vector<1x8x32xf32>
    %108 = arith.addf %76, %107 : vector<1x8x32xf32>
    %109 = arith.truncf %101 : vector<1x8x8xf32> to vector<1x8x8xbf16>
    %c0_40 = arith.constant 0 : index
    %c0_41 = arith.constant 0 : index
    %c0_42 = arith.constant 0 : index
    %110 = vector.load %arg14[%c0_40, %c0_41, %c0_42] : memref<1x8x8xbf16, #tpu.memory_space<vmem>>, vector<1x8x8xbf16>
    tpu.vector_store %arg14[%c0_40, %c0_41, %c0_42], %109 {strides = array<i32>} : memref<1x8x8xbf16, #tpu.memory_space<vmem>>, vector<1x8x8xbf16>,
    %c0_43 = arith.constant 0 : index
    %c0_44 = arith.constant 0 : index
    %111 = vector.load %arg10[%c0_43, %c0_44] : memref<1x32xf32, #tpu.memory_space<vmem>>, vector<1x32xf32>
    %c0_45 = arith.constant 0 : index
    %c0_46 = arith.constant 0 : index
    %112 = vector.load %arg11[%c0_45, %c0_46] : memref<1x32xf32, #tpu.memory_space<vmem>>, vector<1x32xf32>
    %cst_47 = arith.constant dense<0.000000e+00> : vector<1x8xf32>
    %113 = vector.multi_reduction <add>, %108, %cst_47 [2] : vector<1x8x32xf32> to vector<1x8xf32>
    %114 = vector.shape_cast %113 : vector<1x8xf32> to vector<1x8x1xf32>
    %cst_48 = arith.constant 3.200000e+01 : f32
    %115 = vector.broadcast %cst_48 : f32 to vector<1x8x1xf32>
    %116 = arith.divf %114, %115 : vector<1x8x1xf32>
    %117 = vector.broadcast %116 : vector<1x8x1xf32> to vector<1x8x32xf32>
    %118 = arith.subf %108, %117 : vector<1x8x32xf32>
    %119 = arith.mulf %118, %118 : vector<1x8x32xf32>
    %cst_49 = arith.constant dense<0.000000e+00> : vector<1x8xf32>
    %120 = vector.multi_reduction <add>, %119, %cst_49 [2] : vector<1x8x32xf32> to vector<1x8xf32>
    %121 = vector.shape_cast %120 : vector<1x8xf32> to vector<1x8x1xf32>
    %cst_50 = arith.constant 3.200000e+01 : f32
    %122 = vector.broadcast %cst_50 : f32 to vector<1x8x1xf32>
    %123 = arith.divf %121, %122 : vector<1x8x1xf32>
    %cst_51 = arith.constant 9.99999974E-6 : f32
    %124 = vector.broadcast %cst_51 : f32 to vector<1x8x1xf32>
    %125 = arith.addf %123, %124 : vector<1x8x1xf32>
    %126 = math.rsqrt %125 : vector<1x8x1xf32>
    %127 = vector.broadcast %126 : vector<1x8x1xf32> to vector<1x8x32xf32>
    %128 = arith.mulf %118, %127 : vector<1x8x32xf32>
    %129 = vector.shape_cast %111 : vector<1x32xf32> to vector<1x1x32xf32>
    %130 = vector.broadcast %129 : vector<1x1x32xf32> to vector<1x8x32xf32>
    %131 = arith.mulf %128, %130 : vector<1x8x32xf32>
    %132 = vector.shape_cast %112 : vector<1x32xf32> to vector<1x1x32xf32>
    %133 = vector.broadcast %132 : vector<1x1x32xf32> to vector<1x8x32xf32>
    %134 = arith.addf %131, %133 : vector<1x8x32xf32>
    %c0_52 = arith.constant 0 : index
    %c0_53 = arith.constant 0 : index
    %c0_54 = arith.constant 0 : index
    %135 = vector.load %arg12[%c0_52, %c0_53, %c0_54] : memref<1x8x32xf32, #tpu.memory_space<vmem>>, vector<1x8x32xf32>
    tpu.vector_store %arg12[%c0_52, %c0_53, %c0_54], %134 {strides = array<i32>} : memref<1x8x32xf32, #tpu.memory_space<vmem>>, vector<1x8x32xf32>,
    return
  }
  func.func @transform_0(%arg0: i32) -> (i32, i32, i32) {
    %c0_i32 = arith.constant 0 : i32
    %c0_i32_0 = arith.constant 0 : i32
    %c0_i32_1 = arith.constant 0 : i32
    return %arg0, %c0_i32, %c0_i32_0 : i32, i32, i32
  }
  func.func @transform_1(%arg0: i32) -> (i32, i32) {
    %c0_i32 = arith.constant 0 : i32
    %c0_i32_0 = arith.constant 0 : i32
    %c0_i32_1 = arith.constant 0 : i32
    return %c0_i32, %c0_i32_0 : i32, i32
  }
  func.func @transform_2(%arg0: i32) -> (i32, i32) {
    %c0_i32 = arith.constant 0 : i32
    %c0_i32_0 = arith.constant 0 : i32
    %c0_i32_1 = arith.constant 0 : i32
    return %c0_i32, %c0_i32_0 : i32, i32
  }
  func.func @transform_3(%arg0: i32) -> (i32, i32) {
    %c0_i32 = arith.constant 0 : i32
    %c0_i32_0 = arith.constant 0 : i32
    %c0_i32_1 = arith.constant 0 : i32
    return %c0_i32, %c0_i32_0 : i32, i32
  }
  func.func @transform_4(%arg0: i32) -> (i32, i32) {
    %c0_i32 = arith.constant 0 : i32
    %c0_i32_0 = arith.constant 0 : i32
    %c0_i32_1 = arith.constant 0 : i32
    return %c0_i32, %c0_i32_0 : i32, i32
  }
  func.func @transform_5(%arg0: i32) -> (i32, i32) {
    %c0_i32 = arith.constant 0 : i32
    %c0_i32_0 = arith.constant 0 : i32
    %c0_i32_1 = arith.constant 0 : i32
    return %c0_i32, %c0_i32_0 : i32, i32
  }
  func.func @transform_6(%arg0: i32) -> (i32, i32) {
    %c0_i32 = arith.constant 0 : i32
    %c0_i32_0 = arith.constant 0 : i32
    %c0_i32_1 = arith.constant 0 : i32
    return %c0_i32, %c0_i32_0 : i32, i32
  }
  func.func @transform_7(%arg0: i32) -> (i32, i32) {
    %c0_i32 = arith.constant 0 : i32
    %c0_i32_0 = arith.constant 0 : i32
    %c0_i32_1 = arith.constant 0 : i32
    return %c0_i32, %c0_i32_0 : i32, i32
  }
  func.func @transform_8(%arg0: i32) -> (i32, i32) {
    %c0_i32 = arith.constant 0 : i32
    %c0_i32_0 = arith.constant 0 : i32
    %c0_i32_1 = arith.constant 0 : i32
    return %c0_i32, %c0_i32_0 : i32, i32
  }
  func.func @transform_9(%arg0: i32) -> (i32, i32) {
    %c0_i32 = arith.constant 0 : i32
    %c0_i32_0 = arith.constant 0 : i32
    %c0_i32_1 = arith.constant 0 : i32
    return %c0_i32, %c0_i32_0 : i32, i32
  }
  func.func @transform_10(%arg0: i32) -> (i32, i32) {
    %c0_i32 = arith.constant 0 : i32
    %c0_i32_0 = arith.constant 0 : i32
    %c0_i32_1 = arith.constant 0 : i32
    return %c0_i32, %c0_i32_0 : i32, i32
  }
  func.func @transform_11(%arg0: i32) -> (i32, i32, i32) {
    %c0_i32 = arith.constant 0 : i32
    %c0_i32_0 = arith.constant 0 : i32
    %c0_i32_1 = arith.constant 0 : i32
    return %arg0, %c0_i32, %c0_i32_0 : i32, i32, i32
  }
  func.func @transform_12(%arg0: i32) -> (i32, i32, i32) {
    %c0_i32 = arith.constant 0 : i32
    %c0_i32_0 = arith.constant 0 : i32
    %c0_i32_1 = arith.constant 0 : i32
    return %arg0, %c0_i32, %c0_i32_0 : i32, i32, i32
  }
  func.func @transform_13(%arg0: i32) -> (i32, i32, i32) {
    %c0_i32 = arith.constant 0 : i32
    %c0_i32_0 = arith.constant 0 : i32
    %c0_i32_1 = arith.constant 0 : i32
    return %arg0, %c0_i32, %c0_i32_0 : i32, i32, i32
  }
}

</mosaic_0001>

<bundles_post_ra>
// kernel: tpu_custom_call.1
= control target key start
LH: loop header
LB: loop body
LE: loop exit
PB: predicated region body
PF: predicated region fallthrough
CT: control target
= control target key end

     0   :  { %s3575_s0 = inlined_call_operand.hbm [shape: f32[2,16,32], index: 0, kind: input, shape index: {}]   ;;  %s3576_s1 = inlined_call_operand.hbm [shape: bf16[32,96], index: 1, kind: input, shape index: {}]   ;;  %s3577_s2 = inlined_call_operand.hbm [shape: bf16[32,32], index: 2, kind: input, shape index: {}]   ;;  %s3578_s3 = inlined_call_operand.hbm [shape: bf16[32,96], index: 3, kind: input, shape index: {}]   ;;  %s3579_s4 = inlined_call_operand.hbm [shape: bf16[32,32], index: 4, kind: input, shape index: {}]   ;;  %s3580_s5 = inlined_call_operand.vmem [shape: bf16[32,32], index: 5, kind: input, shape index: {}]   ;;  %s3581_s6 = inlined_call_operand.hbm [shape: bf16[32,32], index: 6, kind: input, shape index: {}]   ;;  %s3582_s7 = inlined_call_operand.hbm [shape: bf16[32,32], index: 7, kind: input, shape index: {}]   ;;  %s3583_s8 = inlined_call_operand.vmem [shape: f32[1,32], index: 8, kind: input, shape index: {}]   ;;  %s3584_s9 = inlined_call_operand.vmem [shape: f32[1,32], index: 9, kind: input, shape index: {}]   ;;  %s3585_s10 = inlined_call_operand.vmem [shape: f32[1,32], index: 10, kind: input, shape index: {}]   ;;  %s3586_s11 = inlined_call_operand.hbm [shape: f32[2,8,32], index: 11, kind: output, shape index: {0}]   ;;  %s3587_s12 = inlined_call_operand.hbm [shape: bf16[2,16,16], index: 12, kind: output, shape index: {1}]   ;;  %s3588_s13 = inlined_call_operand.hbm [shape: bf16[2,8,8], index: 13, kind: output, shape index: {2}]  }
   0x1   :  { %3599 = sst [smem:[#allocation24_spill]] %s3575_s0 }
   0x2   :  { %3600 = sst [smem:[#allocation25_spill]] %s3576_s1 }
   0x3   :  { %3601 = sst [smem:[#allocation26_spill]] %s3577_s2 }
   0x4   :  { %3602 = sst [smem:[#allocation27_spill]] %s3578_s3 }
   0x5   :  { %3603 = sst [smem:[#allocation28_spill]] %s3579_s4 }
   0x6   :  { %3604 = sst [smem:[#allocation29_spill]] %s3584_s9 }
   0x7   :  { %3605 = sst [smem:[#allocation30_spill]] %s3585_s10 }
   0x8   :  { %3606 = sst [smem:[#allocation31_spill]] %s3586_s11 }
   0x9   :  { %3607 = sst [smem:[#allocation32_spill]] %s3587_s12 }
   0xa   :  { %3608 = sst [smem:[#allocation33_spill]] %s3588_s13 }
   0xb   :  { %19 = vsyncpa [#allocation3], 0 }
   0xc   :  { %21 = vsyncpa [#allocation3 + $0x1], 0 }
   0xd   :  { %22 = vsyncpa [#allocation6], 0 }
   0xe   :  { %23 = vsyncpa [#allocation9], 0 }
   0xf   :  { %24 = vsyncpa [#allocation12], 0 }
  0x10   :  { %25 = vsyncpa [#allocation4], 0 }
  0x11   :  { %27 = vsyncpa [#allocation4 + $0x1], 0 }
  0x12   :  { %28 = vsyncpa [#allocation16], 0 }
  0x13   :  { %30 = vsyncpa [#allocation16 + $0x1], 0  ;;  %s2882_s25 = smov 0   ;;  %s2884_s26 = smov 0  }
  0x14   :  { %s2886_s27 = smov 0   ;;  %s2888_s28 = smov 0  }
  0x15 LB: > { %s2788_s29 = smov [#allocation5]   ;;  %s2903_s14 = sadd.s32 4294967295, %s2786_s28   ;;  %s2786_s28 = sphi %s2888_s28, %s3645_s28   ;;  %s2782_s27 = sphi %s2886_s27, %s3644_s27   ;;  %s2778_s26 = sphi %s2884_s26, %s3643_s26   ;;  %s2774_s25 = sphi %s2882_s25, %s3642_s25  }
  0x16   : > { %s367_s30 = sshll.u32 %s2788_s29, 4  ;;  %p2103_p0 = scmp.ge.s32.totalorder %s2786_s28, 1  ;;  %s2908_s30 = int_to_ptr.vmem [resolvable:$true] %s367_s30 }
  0x17   : > { %p3592_p1 = scmp.eq.s32.totalorder %s2903_s14, 0  ;;  %p355_p2 = scmp.lt.s32.totalorder %s2786_s28, 3 }
  0x18   : > { %s2789_s16 = smov [#allocation8]   ;;  %s2790_s19 = smov [#allocation11]  }
  0x19   : > { %p2910_p3 = pnand %p2103_p0, %p355_p2  ;;  %s393_s17 = sshll.u32 %s2789_s16, 4  ;;  %s2923_s17 = int_to_ptr.vmem [resolvable:$true] %s393_s17 }
  0x1a   : > { %s422_s20 = sshll.u32 %s2790_s19, 4  ;;  %s3611_s1 = sld [smem:[#allocation25_spill]]  ;;  %s2925_s20 = int_to_ptr.vmem [resolvable:$true] %s422_s20 }
  0x1b   : > { %s3609_s15 = scalar_select %p2910_p3, 1, 0 }
  0x1c   : > { %p2319_p5 = pneg %p2910_p3 }
  0x1e   : > { %p2919_p6 = pnand %p2319_p5, %p3592_p1 }
  0x20   : > { %s2450_s23 = scalar_lea.hbm %s3611_s1, 256  ;;  %p2935_p8 = pneg %p2919_p6 }
  0x21   : > { %p2451_p7 = scmp.ne.s32.totalorder %s3611_s1, %s2450_s23  ;;  %p2457_p11 = scmp.lt.u32.totalorder %s2450_s23, %s3611_s1 }
  0x23   : > { %p2453_p9 = pnand %p2935_p8, %p2451_p7 }
  0x25   : > { %p2454_p10 = pneg %p2453_p9 }
  0x27   : > { %p2459_p12 = pnand %p2457_p11, %p2454_p10 }
  0x29   : > { %2462 = shalt.err (!%p2459_p12)
}
  0x2a   : > { %s2463_s21 = scalar_lea.vmem %s2908_s30, 256  ;;  %p2471_p5 = scmp.lt.s32.totalorder %s2908_s30, %s2908_s30 }
  0x2b   : > { %p2464_p13 = scmp.ne.s32.totalorder %s2908_s30, %s2463_s21  ;;  %p2472_p4 = scmp.lt.s32.totalorder %s2463_s21, %s2463_s21 }
  0x2d   : > { %p2466_p0 = pnand %p2464_p13, %p2935_p8  ;;  %p2473_p7 = por %p2472_p4, %p2471_p5 }
  0x2f   : > { %p2467_p2 = pneg %p2466_p0 }
  0x31   : > { %p2474_p9 = pnand %p2473_p7, %p2467_p2 }
  0x33   : > { %2477 = shalt.err (!%p2474_p9)
}
  0x34   : > { %s2791_s22 = smov 64   ;;  %s2792_s11 = smov 4  }
  0x35   : > { %2322 = dma.hbm_to_vmem [thread:$0]  (!%p2919_p6), %s3611_s1, 256, %s2908_s30, [#allocation6], %s2791_s22, %s2791_s22, %s2792_s11  }
  0x36   : > { %s3613_s3 = sld [smem:[#allocation27_spill]] }
  0x3c   : > { %s2478_s21 = scalar_lea.hbm %s3613_s3, 256 }
  0x3d   : > { %p2479_p4 = scmp.ne.s32.totalorder %s3613_s3, %s2478_s21  ;;  %p2485_p12 = scmp.lt.u32.totalorder %s2478_s21, %s3613_s3 }
  0x3f   : > { %p2481_p10 = pnand %p2479_p4, %p2935_p8 }
  0x41   : > { %p2482_p11 = pneg %p2481_p10 }
  0x43   : > { %p2487_p13 = pnand %p2485_p12, %p2482_p11 }
  0x45   : > { %2490 = shalt.err (!%p2487_p13)
}
  0x46   : > { %s2491_s30 = scalar_lea.vmem %s2923_s17, 256  ;;  %p2499_p7 = scmp.lt.s32.totalorder %s2923_s17, %s2923_s17 }
  0x47   : > { %p2492_p0 = scmp.ne.s32.totalorder %s2923_s17, %s2491_s30  ;;  %p2500_p9 = scmp.lt.s32.totalorder %s2491_s30, %s2491_s30 }
  0x49   : > { %p2494_p2 = pnand %p2492_p0, %p2935_p8  ;;  %p2501_p4 = por %p2500_p9, %p2499_p7 }
  0x4b   : > { %p2495_p5 = pneg %p2494_p2 }
  0x4d   : > { %p2502_p10 = pnand %p2501_p4, %p2495_p5 }
  0x4f   : > { %2505 = shalt.err (!%p2502_p10)
}
  0x50   : > { %2328 = dma.hbm_to_vmem [thread:$0]  (!%p2919_p6), %s3613_s3, 256, %s2923_s17, [#allocation9], %s2791_s22, %s2791_s22, %s2792_s11  }
  0x51   : > { %s2506_s23 = scalar_lea.hbm %s3581_s6, 256 }
  0x52   : > { %p2507_p11 = scmp.ne.s32.totalorder %s3581_s6, %s2506_s23  ;;  %p2513_p0 = scmp.lt.u32.totalorder %s2506_s23, %s3581_s6 }
  0x54   : > { %p2509_p12 = pnand %p2507_p11, %p2935_p8 }
  0x56   : > { %p2510_p13 = pneg %p2509_p12 }
  0x58   : > { %p2515_p2 = pnand %p2513_p0, %p2510_p13 }
  0x5a   : > { %2518 = shalt.err (!%p2515_p2)
}
  0x5b   : > { %s2519_s17 = scalar_lea.vmem %s2925_s20, 256  ;;  %p2527_p4 = scmp.lt.s32.totalorder %s2925_s20, %s2925_s20 }
  0x5c   : > { %p2520_p5 = scmp.ne.s32.totalorder %s2925_s20, %s2519_s17  ;;  %p2528_p10 = scmp.lt.s32.totalorder %s2519_s17, %s2519_s17 }
  0x5e   : > { %p2522_p7 = pnand %p2520_p5, %p2935_p8  ;;  %p2529_p11 = por %p2528_p10, %p2527_p4 }
  0x60   : > { %p2523_p9 = pneg %p2522_p7 }
  0x62   : > { %p2530_p12 = pnand %p2529_p11, %p2523_p9 }
  0x64   : > { %2533 = shalt.err (!%p2530_p12)
}
  0x65   : > { %2334 = dma.hbm_to_vmem [thread:$0]  (!%p2919_p6), %s3581_s6, 256, %s2925_s20, [#allocation12], %s2791_s22, %s2791_s22, %s2792_s11  }
  0x66   : > { %s2793_s10 = smov [#allocation7]   ;;  %s2794_s13 = smov [#allocation10]  }
  0x67   : > { %s380_s12 = sshll.u32 %s2793_s10, 4  ;;  %s406_s23 = sshll.u32 %s2794_s13, 4  ;;  %s381_s12 = int_to_ptr.vmem [resolvable:$true] %s380_s12  ;;  %s407_s23 = int_to_ptr.vmem [resolvable:$true] %s406_s23 }
  0x68   : > { %s3614_s2 = sld [smem:[#allocation26_spill]] }
  0x6e   : > { %s2534_s19 = scalar_lea.hbm %s3614_s2, 256 }
  0x6f   : > { %p2535_p13 = scmp.ne.s32.totalorder %s3614_s2, %s2534_s19  ;;  %p2541_p5 = scmp.lt.u32.totalorder %s2534_s19, %s3614_s2 }
  0x71   : > { %p2537_p0 = pnand %p2535_p13, %p2935_p8 }
  0x73   : > { %p2538_p2 = pneg %p2537_p0 }
  0x75   : > { %p2543_p7 = pnand %p2541_p5, %p2538_p2 }
  0x77   : > { %2546 = shalt.err (!%p2543_p7)
}
  0x78   : > { %s2547_s20 = scalar_lea.vmem %s381_s12, 256  ;;  %p2555_p11 = scmp.lt.s32.totalorder %s381_s12, %s381_s12 }
  0x79   : > { %p2548_p9 = scmp.ne.s32.totalorder %s381_s12, %s2547_s20  ;;  %p2556_p12 = scmp.lt.s32.totalorder %s2547_s20, %s2547_s20 }
  0x7b   : > { %p2550_p4 = pnand %p2548_p9, %p2935_p8  ;;  %p2557_p1 = por %p2556_p12, %p2555_p11 }
  0x7d   : > { %p2551_p10 = pneg %p2550_p4 }
  0x7f   : > { %p2558_p3 = pnand %p2557_p1, %p2551_p10 }
  0x81   : > { %2561 = shalt.err (!%p2558_p3)
}
  0x82   : > { %2325 = dma.hbm_to_vmem [thread:$0]  (!%p2919_p6), %s3614_s2, 256, %s381_s12, [#allocation6], %s2791_s22, %s2791_s22, %s2792_s11  }
  0x83   : > { %s3615_s4 = sld [smem:[#allocation28_spill]] }
  0x89   : > { %s2562_s24 = scalar_lea.hbm %s3615_s4, 256 }
  0x8a   : > { %p2563_p1 = scmp.ne.s32.totalorder %s3615_s4, %s2562_s24  ;;  %p2569_p0 = scmp.lt.u32.totalorder %s2562_s24, %s3615_s4 }
  0x8c   : > { %p2565_p3 = pnand %p2563_p1, %p2935_p8 }
  0x8e   : > { %p2566_p13 = pneg %p2565_p3 }
  0x90   : > { %p2571_p2 = pnand %p2569_p0, %p2566_p13 }
  0x92   : > { %2574 = shalt.err (!%p2571_p2)
}
  0x93   : > { %s2575_s30 = scalar_lea.vmem %s407_s23, 256  ;;  %p2583_p4 = scmp.lt.s32.totalorder %s407_s23, %s407_s23 }
  0x94   : > { %p2576_p5 = scmp.ne.s32.totalorder %s407_s23, %s2575_s30  ;;  %p2584_p10 = scmp.lt.s32.totalorder %s2575_s30, %s2575_s30 }
  0x96   : > { %p2578_p7 = pnand %p2576_p5, %p2935_p8  ;;  %p2585_p11 = por %p2584_p10, %p2583_p4 }
  0x98   : > { %p2579_p9 = pneg %p2578_p7 }
  0x9a   : > { %p2586_p12 = pnand %p2585_p11, %p2579_p9 }
  0x9c   : > { %2589 = shalt.err (!%p2586_p12)
}
  0x9d   : > { %2331 = dma.hbm_to_vmem [thread:$0]  (!%p2919_p6), %s3615_s4, 256, %s407_s23, [#allocation9], %s2791_s22, %s2791_s22, %s2792_s11  }
  0x9e   : > { %s2795_s1 = smov [#allocation13]   ;;  %s2590_s24 = scalar_lea.hbm %s3582_s7, 256 }
  0x9f   : > { %s435_s9 = sshll.u32 %s2795_s1, 4  ;;  %p2591_p1 = scmp.ne.s32.totalorder %s3582_s7, %s2590_s24  ;;  %s436_s9 = int_to_ptr.vmem [resolvable:$true] %s435_s9 }
  0xa0   : > { %p2597_p0 = scmp.lt.u32.totalorder %s2590_s24, %s3582_s7 }
  0xa1   : > { %p2593_p3 = pnand %p2591_p1, %p2935_p8 }
  0xa3   : > { %p2594_p13 = pneg %p2593_p3 }
  0xa5   : > { %p2599_p2 = pnand %p2597_p0, %p2594_p13 }
  0xa7   : > { %2602 = shalt.err (!%p2599_p2)
}
  0xa8   : > { %s2603_s23 = scalar_lea.vmem %s436_s9, 256  ;;  %p2611_p4 = scmp.lt.s32.totalorder %s436_s9, %s436_s9 }
  0xa9   : > { %p2604_p5 = scmp.ne.s32.totalorder %s436_s9, %s2603_s23  ;;  %p2612_p10 = scmp.lt.s32.totalorder %s2603_s23, %s2603_s23 }
  0xab   : > { %p2606_p7 = pnand %p2604_p5, %p2935_p8  ;;  %p2613_p11 = por %p2612_p10, %p2611_p4 }
  0xad   : > { %p2607_p9 = pneg %p2606_p7 }
  0xaf   : > { %p2614_p12 = pnand %p2613_p11, %p2607_p9 }
  0xb1   : > { %2617 = shalt.err (!%p2614_p12)
}
  0xb2   : > { %2337 = dma.hbm_to_vmem [thread:$0]  (!%p2919_p6), %s3582_s7, 256, %s436_s9, [#allocation12], %s2791_s22, %s2791_s22, %s2792_s11  }
  0xb3   : > { %s3595_s18 = sadd.s32 4294967294, %s2786_s28   ;;  %s3076_s16 = sadd.s32 1, %s2786_s28  }
  0xb4   : > { %s40_s20 = ssub.s32 %s2786_s28, %s3076_s16  ;;  %s43_s1 = sadd.s32 1, %s2782_s27 }
  0xb5   : > { %p41_p8 = scmp.eq.s32.totalorder %s40_s20, 0  ;;  %p50_p1 = scmp.ne.s32.totalorder %s2782_s27, %s2778_s26 }
  0xb6   : > { %p51_p3 = scmp.eq.s32.totalorder %s2786_s28, 0  ;;  %p56_p13 = scmp.ne.s32.totalorder %s2778_s26, %s2774_s25 }
  0xb7   : > { %s3087_s10 = scalar_select %p41_p8, %s2782_s27, %s43_s1  }
  0xb8   : > { %p3089_p0 = por %p51_p3, %p50_p1  ;;  %p3617_p2 = scmp.eq.s32.totalorder %s2903_s14, 0 }
  0xb9   : > { %p290_p5 = scmp.eq.s32.totalorder %s2903_s14, 1  ;;  %p296_p7 = scmp.eq.s32.totalorder %s3595_s18, 1 }
  0xba   : > { %p3095_p6 = por %p3617_p2, %p56_p13  ;;  %p2358_p9 = scmp.lt.s32.totalorder %s2786_s28, 2 }
  0xbb   : > { %s458_s11 = sand.u32 1, %s2782_s27   ;;  %p3104_p4 = por %p290_p5, %p50_p1 }
  0xbc   : > { %p3108_p10 = por %p296_p7, %p56_p13  ;;  %s2111_s29 = sshll.u32 %s458_s11, 4 }
  0xbd   : > { %s3619_s9 = scalar_select %p3104_p4, 1, 0 }
  0xbe   : > { %s3620_s24 = scalar_select %p3108_p10, 1, 0 }
  0xbf   : > { %s2174_s19 = sshll.u32 %s2786_s28, 8  ;;  %s3621_s0 = sld [smem:[#allocation24_spill]] }
  0xc0   : > { %s462_s30 = scalar_lea.vmem [#allocation2], %s2111_s29  ;;  %p3122_p11 = pnand %p2358_p9, %p3089_p0 }
  0xc1   : > { %s469_s12 = sshll.u32 %s462_s30, 4  ;;  %s3126_s1 = scalar_lea.sflag [#allocation3], %s458_s11  ;;  %s3118_s12 = int_to_ptr.vmem [resolvable:$true] %s469_s12 }
  0xc2   : > { %p2620_p8 = pneg %p3122_p11 }
  0xc5   : > { %s3116_s23 = scalar_lea.hbm %s3621_s0, %s2174_s19  ;;  %s2623_s13 = scalar_lea.hbm %s3621_s0, 512 }
  0xc6   : > { %s2618_s21 = scalar_lea.hbm %s3116_s23, 256  ;;  %p2624_p13 = scmp.lt.u32.totalorder %s3116_s23, %s3621_s0 }
  0xc7   : > { %p2619_p12 = scmp.ne.s32.totalorder %s3116_s23, %s2618_s21  ;;  %p2625_p0 = scmp.lt.u32.totalorder %s2623_s13, %s2618_s21 }
  0xc8   : > { %p2627_p5 = scmp.lt.u32.totalorder %s2618_s21, %s3116_s23 }
  0xc9   : > { %p2621_p1 = pnand %p2620_p8, %p2619_p12  ;;  %p2626_p2 = por %p2625_p0, %p2624_p13 }
  0xcb   : > { %p2622_p3 = pneg %p2621_p1  ;;  %p2628_p7 = por %p2627_p5, %p2626_p2 }
  0xcd   : > { %p2629_p9 = pnand %p2628_p7, %p2622_p3 }
  0xcf   : > { %2632 = shalt.err (!%p2629_p9)
}
  0xd0   : > { %s2633_s11 = scalar_lea.vmem %s3118_s12, 256  ;;  %s2796_s29 = smov [#allocation2]  }
  0xd1   : > { %p2634_p12 = scmp.ne.s32.totalorder %s3118_s12, %s2633_s11  ;;  %s2638_s19 = sshll.u32 %s2796_s29, 4  ;;  %s2639_s19 = int_to_ptr.vmem [resolvable:$false] %s2638_s19 }
  0xd2   : > { %s2640_s17 = scalar_lea.vmem %s2639_s19, 512  ;;  %p2641_p4 = scmp.lt.s32.totalorder %s3118_s12, %s2639_s19 }
  0xd3   : > { %p2636_p1 = pnand %p2634_p12, %p2620_p8  ;;  %p2642_p13 = scmp.lt.s32.totalorder %s2640_s17, %s2633_s11 }
  0xd5   : > { %p2637_p10 = pneg %p2636_p1  ;;  %p2643_p0 = por %p2642_p13, %p2641_p4 }
  0xd7   : > { %p2644_p2 = pnand %p2643_p0, %p2637_p10 }
  0xd9   : > { %2647 = shalt.err (!%p2644_p2)
}
  0xda   : > { %s2797_s21 = smov 128   ;;  %s2798_s13 = smov 8  }
  0xdb   : > { %2341 = dma.hbm_to_vmem [thread:$0]  (!%p3122_p11), %s3116_s23, 256, %s3118_s12, %s3126_s1, %s2797_s21, %s2797_s21, %s2798_s13  }
  0xdc   : > { %p3623_p8 = scmp.ne.s32.totalorder %s3609_s15, 0 }
  0xdd   : > { %s3157_s30 = sand.u32 (!%p3623_p8), 1, %s2778_s26  }
  0xde   : > { %481 = sbr.rel (%p3623_p8) target bundleno = 3491 (0xda3), region = 64  ;;  %s2115_s11 = sshll.u32 (!%p3623_p8), %s3157_s30, 4 }
  0xdf   : > { %s484_s29 = scalar_lea.sflag (!%p3623_p8), [#allocation3], %s3157_s30  ;;  %s487_s19 = scalar_lea.vmem (!%p3623_p8), [#allocation2], %s2115_s11 }
  0xe5   : > { %2749 = dma.done.wait (%p3095_p6), %s484_s29, 256  }
  0xe6   : > { %2751 = vsyncadd (%p3095_p6), %s484_s29, 4294967040  ;;  %p3624_p4 = scmp.eq.s32.totalorder %s2903_s14, 0 }
  0xe8   : > { %2753 = dma.done.wait (%p3624_p4), [#allocation6], 512   ;;  %p3625_p10 = pmov %p3624_p4 }
  0xe9   : > { %p3626_p11 = pmov %p3624_p4 }
  0xea   : > { %2755 = vsyncadd (%p3625_p10), [#allocation6], 4294966784 }
  0xeb   : > { %2757 = dma.done.wait (%p3626_p11), [#allocation9], 512   ;;  %p3627_p3 = pmov %p3624_p4 }
  0xed   : > { %2759 = vsyncadd (%p3627_p3), [#allocation9], 4294966784  ;;  %p3628_p5 = pmov %p3627_p3 }
  0xee   : > { %p3629_p7 = pmov %p3627_p3 }
  0xef   : > { %2761 = dma.done.wait (%p3628_p5), [#allocation12], 512  }
  0xf0   : > { %2763 = vsyncadd (%p3629_p7), [#allocation12], 4294966784  ;;  %v2799_v0 = vmov 0.0   ;;  %vm2800_vm0 = vmmov 0   ;;  %v2418_v1 = vld [vmem:[#allocation5] sm:$0xff]   ;;  %v2419_v2 = vld [vmem:[#allocation5 + $0x8] sm:$0xff]  }
  0xf1   : > { %2207 = vmatprep.subr.bf16.mxu0 %v2799_v0  ;;  %2211 = vmatprep.mubr.msk.bf16.mxu0 %vm2800_vm0, %v2799_v0  ;;  %v3183_v3 = vld [vmem:[%s487_s19] sm:$0xff]  ;;  %v3185_v4 = vld [vmem:[%s487_s19 + $0x8] sm:$0xff]  ;;  %vm588_vm1 = vcmask 261120   ;;  %s2801_s15 = smov 96   ;;  %vm684_vm2 = vcmask 130048   ;;  %s3597_s22 = smov 64  }
  0xf2   : > { %2215 = vmatprep.subr.bf16.mxu1 %v2799_v0  ;;  %2217 = vmatprep.mubr.msk.bf16.mxu1 %vm2800_vm0, %v2799_v0  ;;  %v575_v5 = vpack.c.bf16 %v3185_v4, %v3183_v3  ;;  %v2420_v29 = vld [vmem:[#allocation7] sm:$0xff]   ;;  %s3596_s23 = sshll.u32 %s3157_s30, 3  ;;  %vm821_vm3 = vcmask 125952   ;;  %v2421_v40 = vld [vmem:[#allocation7 + $0x8] sm:$0xff]   ;;  %v2422_v46 = vld [vmem:[#allocation11] sm:$0xff]   ;;  %vm839_vm4 = vcmask 1040384  }
  0xf3   : > { %2208 = vmatpush3.bf16.msra.mxu0 %v2418_v1  ;;  %s3210_s12 = scalar_lea.vmem [#allocation15], %s3596_s23  ;;  %v2423_v47 = vld [vmem:[%s3580_s5] sm:$0xff]   ;;  %v2424_v48 = vld [vmem:[#allocation11 + $0x8] sm:$0xff]   ;;  %vm846_vm5 = vcmask 1046528   ;;  %v2426_v57 = vld [vmem:[#allocation13] sm:$0xff]   ;;  %vm1118_vm8 = vcmask 1042434  }
  0xf4   : > { %2209 = vmatprep.subr.bf16.mxu0 %v2799_v0  ;;  %v2425_v49 = vld [vmem:[%s3580_s5 + $0x8] sm:$0xff]   ;;  %vm1120_vm9 = vcmask 1043459   ;;  %vm1122_vm10 = vcmask 1044484   ;;  %vm1124_vm11 = vcmask 1045509   ;;  %vm1126_vm12 = vcmask 1046534   ;;  %s2124_s29 = sshll.u32 %s3157_s30, 2 }
  0xf5   : > { %vm1128_vm13 = vcmask 1047559   ;;  %vm1235_vm14 = vcmask 1041409   ;;  %vm1355_vm15 = vcmask 64512   ;;  %s3324_s19 = scalar_lea.vmem [#allocation17], %s2124_s29  ;;  %s3598_s20 = sshll.u32 %s2903_s14, 7 }
  0xf6   : > { %s3630_s21 = sld [smem:[#allocation32_spill]]  ;;  %s1898_s11 = sshll.u32 %s3210_s12, 4  ;;  %s3431_s11 = int_to_ptr.vmem [resolvable:$true] %s1898_s11 }
  0xf7   : > { %2210 = vmatpush3.bf16.msra.mxu0 %v2419_v2  ;;  %s2648_s18 = scalar_lea.vmem %s3431_s11, 128  ;;  %p3631_p9 = scmp.ne.s32.totalorder %s3619_s9, 0 }
  0xf8   : > { %2221 = vmatprep.subr.bf16.mxu0 %v2799_v0  ;;  %p2649_p6 = scmp.ne.s32.totalorder %s3431_s11, %s2648_s18  ;;  %s2808_s23 = smov [#allocation15]  }
  0xfa   : > { %2212 = vmatmul.mubr.msk.bf16.vlgmr.msra.gmra.mrb[0].mxu0 %vm588_vm1, %v575_v5  ;;  %p2650_p12 = pnand %p2649_p6, %p3631_p9 }
  0xfb   : > { %2223 = vmatprep.mubr.msk.bf16.mxu0 %vm2800_vm0, %v2799_v0 }
  0xfc   : > { %s3428_s13 = scalar_lea.hbm %s3630_s21, %s3598_s20  ;;  %p2651_p1 = pneg %p2650_p12 }
 0x1cd   : > { %v626_v6 = vpop.f32.mrb[0].mxu0 }
 0x1ce   : > { %v2213_v7 = vpop.f32.mrb[1].mxu0 }
 0x1cf   : > { %v629_v8 = vpop.f32.mrb[2].mxu0  ;;  %v2429_v7 = vld [vmem:[#allocation8 + $0x8] sm:$0xff]  }
 0x1d0   : > { %v633_v9 = vpack.c.bf16 %v629_v8, %v626_v6  ;;  %v2214_v10 = vpop.f32.mrb[3].mxu0  ;;  %v2428_v6 = vld [vmem:[#allocation8] sm:$0xff]  }
 0x1d2   : > { %635 = vrot.lane.b32.xlu0 %v633_v9, %s2801_s15 }
 0x244   : > { %v636_v11 = vpop.permute.xlu0 %635 }
 0x245   : > { %v641_v12 = vsel %vm588_vm1, %v636_v11, 0 }
 0x246   : > { %2216 = vmatpush3.bf16.xpose.msra.mxu1 %v641_v12 }
 0x247   : > { %2227 = vmatprep.subr.bf16.mxu1 %v2799_v0 }
 0x24d   : > { %2218 = vmatmul.mubr.msk.bf16.vlgmr.msra.gmra.mrb[0].mxu1 %vm588_vm1, %v633_v9 }
 0x24e   : > { %2231 = vmatprep.mubr.msk.bf16.mxu1 %vm2800_vm0, %v2799_v0  ;;  %2228 = vmatpush3.bf16.msra.mxu1 %v2420_v29 }
 0x24f   : > { %2229 = vmatprep.subr.bf16.mxu1 %v2799_v0 }
 0x252   : > { %2230 = vmatpush3.bf16.msra.mxu1 %v2421_v40 }
 0x253   : > { %2243 = vmatprep.subr.bf16.mxu1 %v2799_v0 }
 0x320   : > { %v677_v13 = vpop.f32.mrb[0].mxu1 }
 0x321   : > { %v2219_v14 = vpop.f32.mrb[1].mxu1  ;;  %v685_v15 = vsel %vm684_vm2, %v677_v13, -inf }
 0x322   : > { %686 = vmax.xlane.f32.xlu0 %v685_v15  ;;  %v680_v16 = vpop.f32.mrb[2].mxu1 }
 0x323   : > { %v2220_v17 = vpop.f32.mrb[3].mxu1  ;;  %v688_v18 = vsel %vm684_vm2, %v680_v16, -inf }
 0x324   : > { %689 = vmax.xlane.f32.xlu1 %v688_v18  ;;  %v2144_v18 = vld [vmem:[%s3583_s8] ss:$0 sm:$0xff] }
 0x3af   : > { %v687_v19 = vpop.xlane.xlu0 %686 }
 0x3b0   : > { %v691_v20 = vsub.f32 %v677_v13, %v687_v19 }
 0x3b1   : > { %v690_v21 = vpop.xlane.xlu1 %689 }
 0x3b2   : > { %v693_v22 = vmul.f32 1.442695, %v691_v20  ;;  %v692_v23 = vsub.f32 %v680_v16, %v690_v21 }
 0x3b4   : > { %2432 = vpow2.f32 %v693_v22  ;;  %v695_v24 = vmul.f32 1.442695, %v692_v23 }
 0x3b6   : > { %2434 = vpow2.f32 %v695_v24 }
 0x3be   : > { %v2433_v25 = vpop.eup %2432 }
 0x3bf   : > { %v697_v26 = vsel %vm684_vm2, %v2433_v25, 0.0 }
 0x3c0   : > { %v2435_v27 = vpop.eup %2434  ;;  %698 = vadd.xlane.f32.xlu1 %v697_v26 }
 0x3c1   : > { %v700_v28 = vsel %vm684_vm2, %v2435_v27, 0.0 }
 0x3c4   : > { %701 = vadd.xlane.f32.xlu1 %v700_v28 }
 0x3d5   : > { %708 = vrot.lane.b32.xlu1 %v633_v9, %s3597_s22 }
 0x44d   : > { %v699_v30 = vpop.xlane.xlu1 %698 }
 0x44e   : > { %2436 = vrcp.f32 %v699_v30 }
 0x451   : > { %v702_v31 = vpop.xlane.xlu1 %701 }
 0x452   : > { %2438 = vrcp.f32 %v702_v31  ;;  %v2803_v31 = vmov 1983009808  }
 0x455   : > { %v709_v32 = vpop.permute.xlu1 %708 }
 0x456   : > { %2222 = vmatpush3.bf16.msra.mxu0 %v709_v32  ;;  %v1050_v32 = vunpack.c.l.s4 %v2803_v31 }
 0x457   : > { %2235 = vmatprep.subr.bf16.mxu0 %v2799_v0 }
 0x458   : > { %v2437_v33 = vpop.eup %2436 }
 0x459   : > { %v705_v34 = vmul.f32 %v2437_v33, %v2433_v25  ;;  %v1052_v33 = vlaneseq }
 0x45b   : > { %v2175_v35 = vpack.c.bf16 %v705_v34, %v705_v34 }
 0x45c   : > { %v2439_v36 = vpop.eup %2438 }
 0x45d   : > { %v706_v37 = vmul.f32 %v2439_v36, %v2435_v27  ;;  %822 = vst.msk [vmem:[%s3210_s12] sm:$0xf] %vm821_vm3, %v2175_v35  ;;  %v3251_v35 = vshrl.u32 %v1052_v33, 7 }
 0x45f   : > { %v2176_v38 = vpack.c.bf16 %v706_v37, %v706_v37  ;;  %v707_v39 = vpack.c.bf16 %v706_v37, %v705_v34  ;;  %v1051_v34 = vunpack.c.0.s8 %v1050_v32 }
 0x461   : > { %2224 = vmatmul.mubr.msk.bf16.vlgmr.msra.gmra.mrb[4].mxu0 %vm684_vm2, %v707_v39  ;;  %823 = vst.msk [vmem:[%s3210_s12 + $0x4] sm:$0xf] %vm821_vm3, %v2176_v38  ;;  %v3254_v37 = vsub.s32 %v1051_v34, %v3251_v35  ;;  %vm1511_vm2 = vcmask 60416  }
 0x462   : > { %2239 = vmatprep.mubr.msk.bf16.mxu0 %vm2800_vm0, %v2799_v0  ;;  %2236 = vmatpush3.bf16.msra.mxu0 %v2422_v46 }
 0x463   : > { %2237 = vmatprep.subr.bf16.mxu0 %v2799_v0 }
 0x466   : > { %2238 = vmatpush3.bf16.msra.mxu0 %v2424_v48 }
 0x467   : > { %2251 = vmatprep.subr.bf16.mxu0 %v2799_v0 }
 0x534   : > { %v748_v41 = vpop.f32.mrb[4].mxu0 }
 0x535   : > { %v2225_v42 = vpop.f32.mrb[5].mxu0 }
 0x536   : > { %v751_v43 = vpop.f32.mrb[6].mxu0 }
 0x537   : > { %v755_v44 = vpack.c.bf16 %v751_v43, %v748_v41  ;;  %v2226_v45 = vpop.f32.mrb[7].mxu0 }
 0x539   : > { %2232 = vmatmul.mubr.msk.bf16.vlgmr.msra.gmra.mrb[4].mxu1 %vm588_vm1, %v755_v44  ;;  %v1092_v44 = vsub.s32 1, %v3251_v35 }
 0x53a   : > { %2247 = vmatprep.mubr.msk.bf16.mxu1 %vm2800_vm0, %v2799_v0  ;;  %2244 = vmatpush3.bf16.msra.mxu1 %v2423_v47 }
 0x53b   : > { %2245 = vmatprep.subr.bf16.mxu1 %v2799_v0 }
 0x53e   : > { %2246 = vmatpush3.bf16.msra.mxu1 %v2425_v49 }
 0x53f   : > { %2259 = vmatprep.subr.bf16.mxu1 %v2799_v0 }
 0x60c   : > { %v805_v50 = vpop.f32.mrb[4].mxu1 }
 0x60d   : > { %v812_v51 = vadd.f32 %v805_v50, %v3183_v3  ;;  %v2233_v52 = vpop.f32.mrb[5].mxu1 }
 0x60e   : > { %v808_v53 = vpop.f32.mrb[6].mxu1 }
 0x60f   : > { %v840_v54 = vrot.slane %v812_v51, 7  ;;  %v813_v55 = vadd.f32 %v808_v53, %v3185_v4  ;;  %v2234_v56 = vpop.f32.mrb[7].mxu1  ;;  %v847_v58 = vrot.slane %v812_v51, 1  ;;  %v2427_v4 = vld [vmem:[#allocation13 + $0x8] sm:$0xff]  }
 0x611   : > { %v841_v59 = vrot.slane %v813_v55, 7  ;;  %v848_v60 = vrot.slane %v813_v55, 1  ;;  %v854_v61 = vpack.c.bf16 %v813_v55, %v812_v51  ;;  %v845_v62 = vsel %vm839_vm4, 0.0, %v840_v54 }
 0x613   : > { %v842_v63 = vsel %vm839_vm4, %v840_v54, %v841_v59  ;;  %v849_v1 = vsel %vm846_vm5, %v847_v58, %v848_v60  ;;  %v852_v2 = vsel %vm846_vm5, %v848_v60, 0.0  ;;  %2240 = vmatmul.mubr.msk.bf16.vlgmr.msra.gmra.mrb[8].mxu0 %vm588_vm1, %v854_v61 }
 0x614   : > { %v853_v3 = vpack.c.bf16 %v842_v63, %v845_v62  ;;  %v967_v5 = vpack.c.bf16 %v852_v2, %v849_v1  ;;  %2252 = vmatpush3.bf16.msra.mxu0 %v2426_v57  ;;  %2255 = vmatprep.mubr.msk.bf16.mxu0 %vm2800_vm0, %v2799_v0 }
 0x615   : > { %2253 = vmatprep.subr.bf16.mxu0 %v2799_v0 }
 0x616   : > { %2248 = vmatmul.mubr.msk.bf16.vlgmr.msra.gmra.mrb[8].mxu1 %vm588_vm1, %v853_v3 }
 0x617   : > { %2263 = vmatprep.mubr.msk.bf16.mxu1 %vm2800_vm0, %v2799_v0  ;;  %2260 = vmatpush3.bf16.msra.mxu1 %v2428_v6 }
 0x618   : > { %2254 = vmatpush3.bf16.msra.mxu0 %v2427_v4  ;;  %2261 = vmatprep.subr.bf16.mxu1 %v2799_v0 }
 0x619   : > { %2267 = vmatprep.subr.bf16.mxu0 %v2799_v0 }
 0x61b   : > { %2256 = vmatmul.mubr.msk.bf16.vlgmr.msra.gmra.mrb[12].mxu0 %vm588_vm1, %v967_v5  ;;  %2262 = vmatpush3.bf16.msra.mxu1 %v2429_v7 }
 0x61c   : > { %2269 = vmatprep.mubr.msk.bf16.mxu0 %vm2800_vm0, %v2799_v0  ;;  %2273 = vmatprep.subr.bf16.mxu1 %v2799_v0 }
 0x6e6   : > { %v904_v8 = vpop.f32.mrb[8].mxu0 }
 0x6e7   : > { %v2241_v9 = vpop.f32.mrb[9].mxu0 }
 0x6e8   : > { %v907_v10 = vpop.f32.mrb[10].mxu0 }
 0x6e9   : > { %v2242_v11 = vpop.f32.mrb[11].mxu0  ;;  %v960_v12 = vpop.f32.mrb[8].mxu1 }
 0x6ea   : > { %v961_v13 = vadd.f32 %v960_v12, %v904_v8  ;;  %v2249_v14 = vpop.f32.mrb[9].mxu1 }
 0x6eb   : > { %v963_v15 = vpop.f32.mrb[10].mxu1 }
 0x6ec   : > { %v964_v16 = vadd.f32 %v963_v15, %v907_v10  ;;  %v2250_v17 = vpop.f32.mrb[11].mxu1 }
 0x6ee   : > { %v1017_v19 = vpop.f32.mrb[12].mxu0 }
 0x6ef   : > { %v1024_v20 = vadd.f32 %v1017_v19, %v961_v13  ;;  %v2257_v21 = vpop.f32.mrb[13].mxu0 }
 0x6f0   : > { %v1020_v22 = vpop.f32.mrb[14].mxu0 }
 0x6f1   : > { %v1032_v23 = vadd.f32 %v2144_v18, %v1024_v20  ;;  %v1025_v24 = vadd.f32 %v1020_v22, %v964_v16  ;;  %v2258_v25 = vpop.f32.mrb[15].mxu0 }
 0x6f3   : > { %v1036_v26 = vmin.f32 %v1032_v23, 0.0  ;;  %v1033_v27 = vadd.f32 %v2144_v18, %v1025_v24  ;;  %vm1034_vm6 = vcmp.gt.f32.partialorder %v1032_v23, 0.0 }
 0x6f5   : > { %v1038_v28 = vmul.f32 1.442695, %v1036_v26  ;;  %v1037_v29 = vmin.f32 %v1033_v27, 0.0  ;;  %vm1035_vm7 = vcmp.gt.f32.partialorder %v1033_v27, 0.0 }
 0x6f7   : > { %2440 = vpow2.f32 %v1038_v28  ;;  %v1040_v30 = vmul.f32 1.442695, %v1037_v29 }
 0x6f9   : > { %2442 = vpow2.f32 %v1040_v30 }
 0x701   : > { %v2441_v36 = vpop.eup %2440 }
 0x702   : > { %v2145_v38 = vadd.f32 -1.0, %v2441_v36 }
 0x703   : > { %v2443_v39 = vpop.eup %2442 }
 0x704   : > { %v1044_v40 = vsel %vm1034_vm6, %v1032_v23, %v2145_v38  ;;  %v2146_v41 = vadd.f32 -1.0, %v2443_v39 }
 0x705   : > { %v1048_v42 = vcombine.high %v1044_v40, %v1044_v40  ;;  %v1055_v43 = vrot.slane %v1044_v40, %v3254_v37 }
 0x706   : > { %v1045_v45 = vsel %vm1035_vm7, %v1033_v27, %v2146_v41 }
 0x707   : > { %v1062_v46 = vrot.slane %v1048_v42, %v3254_v37  ;;  %v1063_v47 = vcombine.high %v1055_v43, %v1055_v43  ;;  %v1065_v48 = vcombine.high %v1045_v45, %v1045_v45  ;;  %v1072_v49 = vrot.slane %v1045_v45, %v3254_v37 }
 0x708   : > { %v1093_v51 = vrot.slane %v1055_v43, %v1092_v44  ;;  %v2147_v62 = vrot.slane %v1055_v43, 9 }
 0x709   : > { %v1064_v50 = vcombine.high %v1062_v46, %v1062_v46  ;;  %v1097_v52 = vrot.slane %v1063_v47, %v1092_v44  ;;  %v1101_v53 = vrot.slane %v1062_v46, %v1092_v44  ;;  %v1079_v54 = vrot.slane %v1065_v48, %v3254_v37 }
 0x70a   : > { %v1080_v55 = vcombine.high %v1072_v49, %v1072_v49  ;;  %v1109_v59 = vrot.slane %v1072_v49, %v1092_v44  ;;  %v2148_v2 = vrot.slane %v1063_v47, 9  ;;  %v2151_v4 = vrot.slane %v1072_v49, 9 }
 0x70b   : > { %v1105_v56 = vrot.slane %v1064_v50, %v1092_v44  ;;  %v1119_v57 = vsel %vm1118_vm8, %v1097_v52, %v1093_v51  ;;  %v1117_v63 = vrot.slane %v1079_v54, %v1092_v44  ;;  %v1081_v3 = vcombine.high %v1079_v54, %v1079_v54 }
 0x70c   : > { %v1121_v58 = vsel %vm1120_vm9, %v1101_v53, %v1119_v57  ;;  %v1113_v60 = vrot.slane %v1080_v55, %v1092_v44  ;;  %v2149_v6 = vrot.slane %v1062_v46, 9  ;;  %v2150_v8 = vrot.slane %v1064_v50, 9 }
 0x70d   : > { %v1123_v61 = vsel %vm1122_vm10, %v1105_v56, %v1121_v58  ;;  %v2152_v10 = vrot.slane %v1080_v55, 9  ;;  %v2153_v11 = vrot.slane %v1079_v54, 9  ;;  %v1156_v12 = vmax.f32 %v1055_v43, %v2147_v62 }
 0x70e   : > { %v1125_v1 = vsel %vm1124_vm11, %v1109_v59, %v1123_v61  ;;  %v1157_v15 = vmax.f32 %v1063_v47, %v2148_v2  ;;  %v2154_v16 = vrot.slane %v1081_v3, 9  ;;  %v1160_v17 = vmax.f32 %v1072_v49, %v2151_v4 }
 0x70f   : > { %v1127_v5 = vsel %vm1126_vm12, %v1113_v60, %v1125_v1  ;;  %v1158_v22 = vmax.f32 %v1062_v46, %v2149_v6  ;;  %v1159_v23 = vmax.f32 %v1064_v50, %v2150_v8  ;;  %v1161_v24 = vmax.f32 %v1080_v55, %v2152_v10 }
 0x710   : > { %v1129_v7 = vsel %vm1128_vm13, %v1117_v63, %v1127_v5  ;;  %v1162_v25 = vmax.f32 %v1079_v54, %v2153_v11  ;;  %v1163_v30 = vmax.f32 %v1081_v3, %v2154_v16 }
 0x711   : > { %v1131_v9 = vsel %vm839_vm4, -inf, %v1129_v7 }
 0x712   : > { %v1165_v13 = vcombine.high %v1131_v9, %v1131_v9  ;;  %v1172_v14 = vrot.slane %v1131_v9, %v3254_v37 }
 0x714   : > { %v1179_v18 = vrot.slane %v1165_v13, %v3254_v37  ;;  %v1180_v19 = vcombine.high %v1172_v14, %v1172_v14  ;;  %v1182_v20 = vrot.slane %v1172_v14, 1  ;;  %v3270_v21 = vmax.f32 %v1156_v12, %v1172_v14 }
 0x716   : > { %v1181_v26 = vcombine.high %v1179_v18, %v1179_v18  ;;  %v1184_v27 = vrot.slane %v1179_v18, 1  ;;  %v3272_v28 = vmax.f32 %v1157_v15, %v1182_v20  ;;  %v3274_v29 = vmax.f32 %v1160_v17, %v1179_v18 }
 0x717   : > { %v1183_v31 = vrot.slane %v1180_v19, 1  ;;  %v3276_v32 = vmax.f32 %v1158_v22, %v1180_v19  ;;  %v1210_v33 = vpack.c.bf16 %v3270_v21, %v3270_v21 }
 0x718   : > { %v3280_v34 = vmax.f32 %v1161_v24, %v1184_v27  ;;  %v3282_v36 = vmax.f32 %v1162_v25, %v1181_v26  ;;  %v1214_v38 = vpack.c.bf16 %v3274_v29, %v3274_v29  ;;  %v1185_v39 = vrot.slane %v1181_v26, 1  ;;  %v2430_v26 = vld [vmem:[#allocation10] sm:$0xff]  }
 0x719   : > { %v3286_v40 = vmax.f32 %v1159_v23, %v1183_v31  ;;  %v1211_v41 = vpack.c.bf16 %v3272_v28, %v3272_v28  ;;  %v1212_v42 = vpack.c.bf16 %v3276_v32, %v3276_v32  ;;  %v1226_v51 = vunpack.c.l.b16 %v1210_v33 }
 0x71a   : > { %v3292_v43 = vmax.f32 %v1163_v30, %v1185_v39  ;;  %v1215_v44 = vpack.c.bf16 %v3280_v34, %v3280_v34  ;;  %v1216_v45 = vpack.c.bf16 %v3282_v36, %v3282_v36  ;;  %v1230_v49 = vunpack.c.l.b16 %v1214_v38 }
 0x71b   : > { %v1213_v46 = vpack.c.bf16 %v3286_v40, %v3286_v40  ;;  %v1227_v47 = vunpack.c.l.b16 %v1211_v41  ;;  %v1228_v48 = vunpack.c.l.b16 %v1212_v42  ;;  %v2431_v41 = vld [vmem:[#allocation10 + $0x8] sm:$0xff]  }
 0x71c   : > { %v1217_v50 = vpack.c.bf16 %v3292_v43, %v3292_v43  ;;  %v1231_v53 = vunpack.c.l.b16 %v1215_v44  ;;  %v1232_v56 = vunpack.c.l.b16 %v1216_v45  ;;  %v1241_v60 = vrot.slane %v1230_v49, 4 }
 0x71d   : > { %v1229_v52 = vunpack.c.l.b16 %v1213_v46  ;;  %v1234_v54 = vrot.slane %v1227_v47, 7  ;;  %v1237_v55 = vrot.slane %v1228_v48, 6 }
 0x71e   : > { %v1233_v57 = vunpack.c.l.b16 %v1217_v50  ;;  %v1243_v63 = vrot.slane %v1231_v53, 3  ;;  %v1245_v2 = vrot.slane %v1232_v56, 2 }
 0x71f   : > { %v1236_v58 = vsel %vm1235_vm14, %v1234_v54, %v1226_v51  ;;  %v1239_v59 = vrot.slane %v1229_v52, 5  ;;  %v3330_v51 = vsub.s32 0, %v3251_v35 }
 0x720   : > { %v1238_v61 = vsel %vm1118_vm8, %v1237_v55, %v1236_v58  ;;  %v1247_v5 = vrot.slane %v1233_v57, 1 }
 0x721   : > { %v1240_v62 = vsel %vm1120_vm9, %v1239_v59, %v1238_v61 }
 0x722   : > { %v1242_v1 = vsel %vm1122_vm10, %v1241_v60, %v1240_v62 }
 0x723   : > { %v1244_v3 = vsel %vm1124_vm11, %v1243_v63, %v1242_v1 }
 0x724   : > { %v1246_v4 = vsel %vm1126_vm12, %v1245_v2, %v1244_v3 }
 0x725   : > { %v1248_v6 = vsel %vm1128_vm13, %v1247_v5, %v1246_v4 }
 0x726   : > { %v1249_v7 = vpack.c.b16 %v1248_v6, %v1248_v6 }
 0x728   : > { %2264 = vmatmul.mubr.msk.bf16.vlgmr.msra.gmra.mrb[12].mxu1 %vm588_vm1, %v1249_v7 }
 0x729   : > { %2275 = vmatprep.mubr.msk.bf16.mxu1 %vm2800_vm0, %v2799_v0 }
 0x7fb   : > { %v1299_v8 = vpop.f32.mrb[12].mxu1 }
 0x7fc   : > { %v1305_v9 = vpack.c.bf16 %v1299_v8, %v1299_v8  ;;  %v2265_v10 = vpop.f32.mrb[13].mxu1 }
 0x7fd   : > { %v1302_v11 = vpop.f32.mrb[14].mxu1 }
 0x7fe   : > { %1307 = vrot.lane.b32.xlu1 %v1305_v9, %s2801_s15  ;;  %v2266_v12 = vpop.f32.mrb[15].mxu1  ;;  %s1866_s15 = sand.u32 1, %s2903_s14  }
 0x7ff   : > { %s3433_s29 = scalar_lea.sflag [#allocation16], %s1866_s15 }
 0x870   : > { %v1308_v13 = vpop.permute.xlu1 %1307 }
 0x871   : > { %v1313_v14 = vsel %vm588_vm1, %v1308_v13, 0 }
 0x872   : > { %2268 = vmatpush3.bf16.xpose.msra.mxu0 %v1313_v14  ;;  %v2804_v14 = vmov 269488144  }
 0x873   : > { %2279 = vmatprep.subr.bf16.mxu0 %v2799_v0 }
 0x879   : > { %2270 = vmatmul.mubr.msk.bf16.vlgmr.msra.gmra.mrb[16].mxu0 %vm588_vm1, %v1305_v9 }
 0x87a   : > { %2283 = vmatprep.mubr.msk.bf16.mxu0 %vm2800_vm0, %v2799_v0  ;;  %2280 = vmatpush3.bf16.msra.mxu0 %v2430_v26  ;;  %vm1373_vm0 = vcmask 1043456  }
 0x87b   : > { %2281 = vmatprep.subr.bf16.mxu0 %v2799_v0 }
 0x87e   : > { %2282 = vmatpush3.bf16.msra.mxu0 %v2431_v41 }
 0x94c   : > { %v1349_v15 = vpop.f32.mrb[16].mxu0 }
 0x94d   : > { %v2271_v16 = vpop.f32.mrb[17].mxu0  ;;  %v1356_v17 = vsel %vm1355_vm15, %v1349_v15, -inf }
 0x94e   : > { %1357 = vmax.xlane.f32.xlu1 %v1356_v17  ;;  %v1352_v18 = vpop.f32.mrb[18].mxu0  ;;  %v2805_v16 = vmov 842150450  }
 0x94f   : > { %v2272_v19 = vpop.f32.mrb[19].mxu0  ;;  %v1577_v17 = vunpack.c.l.s4 %v2805_v16  ;;  %v2806_v18 = vmov 1414812756  }
 0x950   : > { %v1584_v19 = vunpack.c.l.s4 %v2806_v18 }
 0x9db   : > { %v1358_v20 = vpop.xlane.xlu1 %1357 }
 0x9dc   : > { %v1359_v22 = vsub.f32 %v1349_v15, %v1358_v20  ;;  %v1570_v15 = vunpack.c.l.s4 %v2804_v14  ;;  %v2807_v20 = vmov 1987475062  }
 0x9de   : > { %v1360_v23 = vmul.f32 1.442695, %v1359_v22  ;;  %v1591_v22 = vunpack.c.l.s4 %v2807_v20 }
 0x9e0   : > { %2444 = vpow2.f32 %v1360_v23  ;;  %v1571_v23 = vunpack.c.0.s8 %v1570_v15  ;;  %v1592_v26 = vunpack.c.0.s8 %v1591_v22 }
 0x9ea   : > { %v2445_v24 = vpop.eup %2444 }
 0x9eb   : > { %v1362_v25 = vsel %vm1355_vm15, %v2445_v24, 0.0 }
 0x9ec   : > { %1363 = vadd.xlane.f32.xlu0 %v1362_v25  ;;  %v1585_v25 = vunpack.c.0.s8 %v1584_v19 }
 0xa02   : > { %1368 = vrot.lane.b32.xlu0 %v1305_v9, %s3597_s22  ;;  %s2652_s22 = sshll.u32 %s2808_s23, 4  ;;  %s2653_s22 = int_to_ptr.vmem [resolvable:$false] %s2652_s22 }
 0xa03   : > { %s2654_s0 = scalar_lea.vmem %s2653_s22, 256  ;;  %p2655_p13 = scmp.lt.s32.totalorder %s3431_s11, %s2653_s22 }
 0xa04   : > { %p2656_p0 = scmp.lt.s32.totalorder %s2654_s0, %s2648_s18 }
 0xa06   : > { %p2657_p2 = por %p2656_p0, %p2655_p13 }
 0xa08   : > { %p2658_p8 = pnand %p2657_p2, %p2651_p1 }
 0xa79   : > { %v1364_v27 = vpop.xlane.xlu0 %1363 }
 0xa7a   : > { %2446 = vrcp.f32 %v1364_v27  ;;  %v3358_v27 = vsub.s32 %v1571_v23, %v3251_v35 }
 0xa7d   : > { %v1369_v30 = vpop.permute.xlu0 %1368 }
 0xa7e   : > { %v1375_v31 = vsel %vm1373_vm0, %v1369_v30, 0 }
 0xa7f   : > { %2274 = vmatpush3.bf16.msra.mxu1 %v1375_v31  ;;  %v3364_v31 = vsub.s32 %v1585_v25, %v3251_v35 }
 0xa84   : > { %v2447_v33 = vpop.eup %2446 }
 0xa85   : > { %v1366_v38 = vmul.f32 %v2447_v33, %v2445_v24  ;;  %v1578_v24 = vunpack.c.0.s8 %v1577_v17  ;;  %v3367_v33 = vsub.s32 %v1592_v26, %v3251_v35 }
 0xa87   : > { %v1367_v39 = vpack.c.bf16 %v1366_v38, %v1366_v38  ;;  %v3361_v30 = vsub.s32 %v1578_v24, %v3251_v35 }
 0xa89   : > { %2276 = vmatmul.mubr.msk.bf16.vlgmr.msra.gmra.mrb[16].mxu1 %vm1355_vm15, %v1367_v39  ;;  %1512 = vst.msk [vmem:[%s3324_s19] sm:$0xf] %vm1511_vm2, %v1367_v39 }
 0xb5c   : > { %v1411_v0 = vpop.f32.mrb[16].mxu1 }
 0xb5d   : > { %v1417_v42 = vpack.c.bf16 %v1411_v0, %v1411_v0  ;;  %v2277_v44 = vpop.f32.mrb[17].mxu1 }
 0xb5e   : > { %v1414_v45 = vpop.f32.mrb[18].mxu1 }
 0xb5f   : > { %v2278_v46 = vpop.f32.mrb[19].mxu1  ;;  %2284 = vmatmul.mubr.msk.bf16.vlgmr.msra.gmra.mrb[20].mxu0 %vm588_vm1, %v1417_v42 }
 0xc32   : > { %v1467_v47 = vpop.f32.mrb[20].mxu0 }
 0xc33   : > { %v1474_v48 = vcombine.high %v1467_v47, %v1467_v47  ;;  %v1481_v49 = vrot.slane %v1467_v47, %v3254_v37  ;;  %v2285_v50 = vpop.f32.mrb[21].mxu0 }
 0xc34   : > { %v1470_v52 = vpop.f32.mrb[22].mxu0 }
 0xc35   : > { %v1488_v53 = vrot.slane %v1474_v48, %v3254_v37  ;;  %v1489_v54 = vcombine.high %v1481_v49, %v1481_v49  ;;  %v1491_v55 = vrot.slane %v1481_v49, 1  ;;  %v1503_v56 = vadd.f32 %v1481_v49, %v3270_v21  ;;  %v2286_v57 = vpop.f32.mrb[23].mxu0 }
 0xc37   : > { %v1490_v58 = vcombine.high %v1488_v53, %v1488_v53  ;;  %v1492_v59 = vrot.slane %v1489_v54, 1  ;;  %v1493_v60 = vrot.slane %v1488_v53, 1  ;;  %v1504_v61 = vadd.f32 %v1491_v55, %v3272_v28 }
 0xc38   : > { %v1505_v62 = vadd.f32 %v1489_v54, %v3276_v32  ;;  %v1507_v63 = vadd.f32 %v1488_v53, %v3274_v29  ;;  %v1526_v1 = vrot.slane %v1503_v56, %v3330_v51 }
 0xc39   : > { %v1506_v2 = vadd.f32 %v1492_v59, %v3286_v40  ;;  %v1508_v3 = vadd.f32 %v1493_v60, %v3280_v34  ;;  %v1530_v5 = vrot.slane %v1504_v61, %v3330_v51  ;;  %v1494_v4 = vrot.slane %v1490_v58, 1 }
 0xc3a   : > { %v1534_v21 = vrot.slane %v1505_v62, %v3330_v51  ;;  %v1509_v6 = vadd.f32 %v1490_v58, %v3282_v36  ;;  %v1542_v29 = vrot.slane %v1507_v63, %v3330_v51 }
 0xc3b   : > { %v1538_v7 = vrot.slane %v1506_v2, %v3330_v51  ;;  %v1555_v28 = vsel %vm1235_vm14, %v1530_v5, %v1526_v1  ;;  %v1510_v32 = vadd.f32 %v1494_v4, %v3292_v43  ;;  %v1546_v40 = vrot.slane %v1508_v3, %v3330_v51 }
 0xc3c   : > { %v1556_v8 = vsel %vm1118_vm8, %v1534_v21, %v1555_v28  ;;  %v1550_v9 = vrot.slane %v1509_v6, %v3330_v51 }
 0xc3d   : > { %v1557_v34 = vsel %vm1120_vm9, %v1538_v7, %v1556_v8  ;;  %v1554_v36 = vrot.slane %v1510_v32, %v3330_v51 }
 0xc3e   : > { %v1558_v10 = vsel %vm1122_vm10, %v1542_v29, %v1557_v34 }
 0xc3f   : > { %v1559_v11 = vsel %vm1124_vm11, %v1546_v40, %v1558_v10 }
 0xc40   : > { %v1560_v12 = vsel %vm1126_vm12, %v1550_v9, %v1559_v11 }
 0xc41   : > { %v1561_v43 = vsel %vm1128_vm13, %v1554_v36, %v1560_v12 }
 0xc42   : > { %v1563_v13 = vsel %vm588_vm1, %v1561_v43, 0.0 }
 0xc43   : > { %1564 = vadd.xlane.f32.xlu0 %v1563_v13 }
 0xcd0   : > { %v1565_v38 = vpop.xlane.xlu0 %1564 }
 0xcd1   : > { %v1567_v39 = vmul.f32 0.03125, %v1565_v38 }
 0xcd3   : > { %v1575_v41 = vrot.slane %v1567_v39, %v3358_v27  ;;  %v1582_v0 = vrot.slane %v1567_v39, %v3361_v30  ;;  %v1589_v42 = vrot.slane %v1567_v39, %v3364_v31  ;;  %v1596_v44 = vrot.slane %v1567_v39, %v3367_v33 }
 0xcd5   : > { %v1597_v45 = vrot.slane %v1575_v41, 1  ;;  %v1598_v46 = vrot.slane %v1582_v0, 1  ;;  %v1599_v47 = vrot.slane %v1589_v42, 1  ;;  %v1600_v48 = vrot.slane %v1596_v44, 1 }
 0xcd6   : > { %v3373_v49 = vsub.f32 %v1503_v56, %v1575_v41  ;;  %v3375_v50 = vsub.f32 %v1505_v62, %v1582_v0  ;;  %v3377_v35 = vsub.f32 %v1507_v63, %v1589_v42  ;;  %v3385_v55 = vsub.f32 %v1509_v6, %v1596_v44 }
 0xcd7   : > { %v3379_v52 = vsub.f32 %v1504_v61, %v1597_v45  ;;  %v3381_v53 = vsub.f32 %v1506_v2, %v1598_v46  ;;  %v3383_v54 = vsub.f32 %v1508_v3, %v1599_v47  ;;  %v3395_v60 = vsub.f32 %v1510_v32, %v1600_v48 }
 0xcd8   : > { %v1617_v57 = vmul.f32 %v3373_v49, %v3373_v49  ;;  %v1619_v58 = vmul.f32 %v3375_v50, %v3375_v50  ;;  %v1621_v61 = vmul.f32 %v3377_v35, %v3377_v35  ;;  %v1623_v3 = vmul.f32 %v3385_v55, %v3385_v55 }
 0xcd9   : > { %v1618_v56 = vmul.f32 %v3379_v52, %v3379_v52  ;;  %v1620_v59 = vmul.f32 %v3381_v53, %v3381_v53  ;;  %v1622_v1 = vmul.f32 %v3383_v54, %v3383_v54  ;;  %v1624_v5 = vmul.f32 %v3395_v60, %v3395_v60 }
 0xcda   : > { %v1636_v62 = vrot.slane %v1617_v57, %v3330_v51  ;;  %v1644_v2 = vrot.slane %v1619_v58, %v3330_v51  ;;  %v1652_v6 = vrot.slane %v1621_v61, %v3330_v51  ;;  %v1660_v29 = vrot.slane %v1623_v3, %v3330_v51 }
 0xcdb   : > { %v1640_v63 = vrot.slane %v1618_v56, %v3330_v51  ;;  %v1648_v4 = vrot.slane %v1620_v59, %v3330_v51  ;;  %v1656_v28 = vrot.slane %v1622_v1, %v3330_v51  ;;  %v1664_v40 = vrot.slane %v1624_v5, %v3330_v51 }
 0xcdd   : > { %v1665_v21 = vsel %vm1235_vm14, %v1640_v63, %v1636_v62 }
 0xcde   : > { %v1666_v7 = vsel %vm1118_vm8, %v1644_v2, %v1665_v21 }
 0xcdf   : > { %v1667_v32 = vsel %vm1120_vm9, %v1648_v4, %v1666_v7 }
 0xce0   : > { %v1668_v8 = vsel %vm1122_vm10, %v1652_v6, %v1667_v32 }
 0xce1   : > { %v1669_v34 = vsel %vm1124_vm11, %v1656_v28, %v1668_v8 }
 0xce2   : > { %v1670_v9 = vsel %vm1126_vm12, %v1660_v29, %v1669_v34 }
 0xce3   : > { %v1671_v10 = vsel %vm1128_vm13, %v1664_v40, %v1670_v9 }
 0xce4   : > { %v1673_v36 = vsel %vm588_vm1, %v1671_v10, 0.0 }
 0xce5   : > { %1674 = vadd.xlane.f32.xlu1 %v1673_v36 }
 0xce6   : > { %2661 = shalt.err (!%p2658_p8)
}
 0xce7   : > { %s2662_s12 = scalar_lea.hbm %s3428_s13, 128  ;;  %s2666_s23 = scalar_lea.hbm %s3630_s21, 256 }
 0xce8   : > { %p2663_p4 = scmp.ne.s32.totalorder %s3428_s13, %s2662_s12  ;;  %p2667_p3 = scmp.lt.u32.totalorder %s3428_s13, %s3630_s21 }
 0xce9   : > { %p2668_p5 = scmp.lt.u32.totalorder %s2666_s23, %s2662_s12  ;;  %p2670_p6 = scmp.lt.u32.totalorder %s2662_s12, %s3428_s13 }
 0xcea   : > { %p2664_p10 = pnand %p2663_p4, %p3631_p9 }
 0xceb   : > { %p2669_p7 = por %p2668_p5, %p2667_p3 }
 0xcec   : > { %p2665_p11 = pneg %p2664_p10 }
 0xced   : > { %p2671_p12 = por %p2670_p6, %p2669_p7 }
 0xcef   : > { %p2672_p1 = pnand %p2671_p12, %p2665_p11 }
 0xcf1   : > { %2675 = shalt.err (!%p2672_p1)
}
 0xcf2   : > { %s2809_s0 = smov 4   ;;  %s3632_s18 = smov 64  }
 0xcf3   : > { %2314 = dma.vmem_to_hbm [thread:$0]  (%p3631_p9), %s3431_s11, 128, %s3428_s13, %s3433_s29, %s3632_s18, %s3632_s18, %s2809_s0  }
 0xcf4   : > { %s2171_s15 = sshll.u32 %s2903_s14, 6  ;;  %s3633_s17 = sld [smem:[#allocation33_spill]] }
 0xcf5   : > { %s1914_s22 = sshll.u32 %s3324_s19, 4  ;;  %s2810_s2 = smov [#allocation17]   ;;  %s1915_s22 = int_to_ptr.vmem [resolvable:$true] %s1914_s22 }
 0xcf6   : > { %s2676_s20 = scalar_lea.vmem %s1915_s22, 64  ;;  %s2680_s3 = sshll.u32 %s2810_s2, 4  ;;  %s2681_s3 = int_to_ptr.vmem [resolvable:$false] %s2680_s3 }
 0xcf7   : > { %p2677_p13 = scmp.ne.s32.totalorder %s1915_s22, %s2676_s20  ;;  %s2682_s4 = scalar_lea.vmem %s2681_s3, 128 }
 0xcf8   : > { %p2683_p8 = scmp.lt.s32.totalorder %s1915_s22, %s2681_s3  ;;  %p2684_p4 = scmp.lt.s32.totalorder %s2682_s4, %s2676_s20 }
 0xcf9   : > { %p2678_p0 = pnand %p2677_p13, %p3631_p9 }
 0xcfa   : > { %s3463_s12 = scalar_lea.hbm %s3633_s17, %s2171_s15  ;;  %p2685_p10 = por %p2684_p4, %p2683_p8 }
 0xcfb   : > { %p2679_p2 = pneg %p2678_p0 }
 0xcfd   : > { %p2686_p11 = pnand %p2685_p10, %p2679_p2 }
 0xcff   : > { %2689 = shalt.err (!%p2686_p11)
}
 0xd00   : > { %s2690_s19 = scalar_lea.hbm %s3463_s12, 64  ;;  %s2694_s2 = scalar_lea.hbm %s3633_s17, 128 }
 0xd01   : > { %p2691_p3 = scmp.ne.s32.totalorder %s3463_s12, %s2690_s19  ;;  %p2695_p6 = scmp.lt.u32.totalorder %s3463_s12, %s3633_s17 }
 0xd02   : > { %p2696_p12 = scmp.lt.u32.totalorder %s2694_s2, %s2690_s19  ;;  %p2698_p13 = scmp.lt.u32.totalorder %s2690_s19, %s3463_s12 }
 0xd03   : > { %p2692_p5 = pnand %p2691_p3, %p3631_p9 }
 0xd04   : > { %p2697_p1 = por %p2696_p12, %p2695_p6 }
 0xd05   : > { %p2693_p7 = pneg %p2692_p5 }
 0xd06   : > { %p2699_p0 = por %p2698_p13, %p2697_p1 }
 0xd08   : > { %p2700_p2 = pnand %p2699_p0, %p2693_p7 }
 0xd0a   : > { %2703 = shalt.err (!%p2700_p2)
}
 0xd0b   : > { %2315 = dma.vmem_to_hbm [thread:$0]  (%p3631_p9), %s1915_s22, 64, %s3463_s12, %s3433_s29  }
 0xd0c   : > { %s3634_s18 = sld [smem:[#allocation29_spill]]  ;;  %s3635_s23 = sld [smem:[#allocation30_spill]] }
 0xd0d   : > { %s3636_s29 = sshll.u32 %s3157_s30, 3  ;;  %s3637_s19 = sshll.u32 %s2903_s14, 7 }
 0xd0e   : > { %s549_s12 = scalar_lea.vmem [#allocation14], %s3636_s29  ;;  %s3638_s2 = sld [smem:[#allocation31_spill]] }
 0xd0f   : > { %s1885_s22 = sshll.u32 %s549_s12, 4  ;;  %s1862_s3 = scalar_lea.sflag [#allocation4], %s3157_s30  ;;  %s3529_s22 = int_to_ptr.vmem [resolvable:$true] %s1885_s22 }
 0xd10   : > { %s2704_s4 = scalar_lea.vmem %s3529_s22, 128  ;;  %s2811_s14 = smov [#allocation14]  }
 0xd11   : > { %p2705_p8 = scmp.ne.s32.totalorder %s3529_s22, %s2704_s4  ;;  %s2708_s20 = sshll.u32 %s2811_s14, 4  ;;  %s2709_s20 = int_to_ptr.vmem [resolvable:$false] %s2708_s20 }
 0xd12   : > { %v2163_v43 = vld [vmem:[%s3634_s18] ss:$0 sm:$0xff]  ;;  %s2710_s18 = scalar_lea.vmem %s2709_s20, 256  ;;  %p2711_p11 = scmp.lt.s32.totalorder %s3529_s22, %s2709_s20 }
 0xd13   : > { %v1733_v14 = vcombine.high %v2163_v43, %v2163_v43  ;;  %v2164_v15 = vld [vmem:[%s3635_s23] ss:$0 sm:$0xff]  ;;  %v1740_v16 = vrot.slane %v2163_v43, %v3254_v37  ;;  %p2706_p4 = pnand %p2705_p8, %p3631_p9  ;;  %p2712_p3 = scmp.lt.s32.totalorder %s2710_s18, %s2704_s4 }
 0xd14   : > { %v1775_v18 = vcombine.high %v2164_v15, %v2164_v15  ;;  %v1782_v19 = vrot.slane %v2164_v15, %v3254_v37  ;;  %s3527_s0 = scalar_lea.hbm %s3638_s2, %s3637_s19 }
 0xd15   : > { %v1747_v17 = vrot.slane %v1733_v14, %v3254_v37  ;;  %v1748_v20 = vcombine.high %v1740_v16, %v1740_v16  ;;  %v1750_v26 = vrot.slane %v1740_v16, 1  ;;  %p2707_p10 = pneg %p2706_p4  ;;  %p2713_p5 = por %p2712_p3, %p2711_p11 }
 0xd16   : > { %v1789_v23 = vrot.slane %v1775_v18, %v3254_v37  ;;  %v1790_v24 = vcombine.high %v1782_v19, %v1782_v19  ;;  %v1792_v47 = vrot.slane %v1782_v19, 1 }
 0xd17   : > { %v1749_v22 = vcombine.high %v1747_v17, %v1747_v17  ;;  %v1751_v38 = vrot.slane %v1748_v20, 1  ;;  %v1752_v39 = vrot.slane %v1747_v17, 1  ;;  %p2714_p7 = pnand %p2713_p5, %p2707_p10 }
 0xd18   : > { %v1791_v46 = vcombine.high %v1789_v23, %v1789_v23  ;;  %v1793_v48 = vrot.slane %v1790_v24, 1  ;;  %v1794_v21 = vrot.slane %v1789_v23, 1 }
 0xd19   : > { %v1753_v45 = vrot.slane %v1749_v22, 1 }
 0xd72   : > { %v1675_v11 = vpop.xlane.xlu1 %1674 }
 0xd73   : > { %v1676_v12 = vmul.f32 0.03125, %v1675_v11 }
 0xd75   : > { %v1677_v13 = vadd.f32 1e-05, %v1676_v12 }
 0xd77   : > { %2448 = vrsqrt.f32 %v1677_v13 }
 0xd81   : > { %v2449_v25 = vpop.eup %2448 }
 0xd82   : > { %v1686_v41 = vrot.slane %v2449_v25, %v3358_v27  ;;  %v1693_v0 = vrot.slane %v2449_v25, %v3361_v30  ;;  %v1700_v42 = vrot.slane %v2449_v25, %v3364_v31  ;;  %v1707_v44 = vrot.slane %v2449_v25, %v3367_v33 }
 0xd84   : > { %v1708_v57 = vrot.slane %v1686_v41, 1  ;;  %v1709_v58 = vrot.slane %v1693_v0, 1  ;;  %v1710_v37 = vrot.slane %v1700_v42, 1  ;;  %v1711_v56 = vrot.slane %v1707_v44, 1 }
 0xd85   : > { %v1720_v59 = vmul.f32 %v1686_v41, %v3373_v49  ;;  %v1722_v61 = vmul.f32 %v1693_v0, %v3375_v50  ;;  %v1724_v27 = vmul.f32 %v1700_v42, %v3377_v35  ;;  %v1726_v30 = vmul.f32 %v1707_v44, %v3385_v55 }
 0xd86   : > { %v1721_v31 = vmul.f32 %v1708_v57, %v3379_v52  ;;  %v1723_v33 = vmul.f32 %v1709_v58, %v3381_v53  ;;  %v1725_v62 = vmul.f32 %v1710_v37, %v3383_v54  ;;  %v1727_v63 = vmul.f32 %v1711_v56, %v3395_v60 }
 0xd87   : > { %v1762_v1 = vmul.f32 %v1740_v16, %v1720_v59  ;;  %v1764_v2 = vmul.f32 %v1748_v20, %v1722_v61  ;;  %v1766_v3 = vmul.f32 %v1747_v17, %v1724_v27  ;;  %v1768_v50 = vmul.f32 %v1749_v22, %v1726_v30 }
 0xd88   : > { %v1763_v5 = vmul.f32 %v1750_v26, %v1721_v31  ;;  %v1765_v4 = vmul.f32 %v1751_v38, %v1723_v33  ;;  %v1767_v49 = vmul.f32 %v1752_v39, %v1725_v62  ;;  %v1769_v7 = vmul.f32 %v1753_v45, %v1727_v63 }
 0xd89   : > { %v1804_v6 = vadd.f32 %v1782_v19, %v1762_v1  ;;  %v1806_v35 = vadd.f32 %v1790_v24, %v1764_v2  ;;  %v1795_v55 = vrot.slane %v1791_v46, 1  ;;  %v1808_v53 = vadd.f32 %v1789_v23, %v1766_v3 }
 0xd8a   : > { %v1805_v52 = vadd.f32 %v1792_v47, %v1763_v5  ;;  %v1807_v28 = vadd.f32 %v1793_v48, %v1765_v4  ;;  %v1809_v32 = vadd.f32 %v1794_v21, %v1767_v49  ;;  %v1810_v29 = vadd.f32 %v1791_v46, %v1768_v50 }
 0xd8b   : > { %v1823_v54 = vrot.slane %v1804_v6, %v3330_v51  ;;  %v1831_v8 = vrot.slane %v1806_v35, %v3330_v51  ;;  %v1811_v40 = vadd.f32 %v1795_v55, %v1769_v7  ;;  %v1839_v10 = vrot.slane %v1808_v53, %v3330_v51 }
 0xd8c   : > { %v1827_v60 = vrot.slane %v1805_v52, %v3330_v51  ;;  %v1835_v34 = vrot.slane %v1807_v28, %v3330_v51  ;;  %v1843_v11 = vrot.slane %v1809_v32, %v3330_v51  ;;  %v1847_v43 = vrot.slane %v1810_v29, %v3330_v51 }
 0xd8d   : > { %v1851_v14 = vrot.slane %v1811_v40, %v3330_v51 }
 0xd8e   : > { %v1852_v9 = vsel %vm1235_vm14, %v1827_v60, %v1823_v54 }
 0xd8f   : > { %v1853_v36 = vsel %vm1118_vm8, %v1831_v8, %v1852_v9 }
 0xd90   : > { %v1854_v12 = vsel %vm1120_vm9, %v1835_v34, %v1853_v36 }
 0xd91   : > { %v1855_v13 = vsel %vm1122_vm10, %v1839_v10, %v1854_v12 }
 0xd92   : > { %v1856_v15 = vsel %vm1124_vm11, %v1843_v11, %v1855_v13 }
 0xd93   : > { %v1857_v16 = vsel %vm1126_vm12, %v1847_v43, %v1856_v15 }
 0xd94   : > { %v1858_v17 = vsel %vm1128_vm13, %v1851_v14, %v1857_v16 }
 0xd95   : > { %1860 = vst.msk [vmem:[%s549_s12] sm:$0xff] %vm588_vm1, %v1858_v17 }
 0xd96   : > { %2717 = shalt.err (!%p2714_p7)
}
 0xd97   : > { %s2718_s30 = scalar_lea.hbm %s3527_s0, 128  ;;  %s2722_s23 = scalar_lea.hbm %s3638_s2, 256 }
 0xd98   : > { %p2719_p6 = scmp.ne.s32.totalorder %s3527_s0, %s2718_s30  ;;  %p2723_p13 = scmp.lt.u32.totalorder %s3527_s0, %s3638_s2 }
 0xd99   : > { %p2724_p0 = scmp.lt.u32.totalorder %s2722_s23, %s2718_s30  ;;  %p2726_p8 = scmp.lt.u32.totalorder %s2718_s30, %s3527_s0 }
 0xd9a   : > { %p2720_p12 = pnand %p2719_p6, %p3631_p9 }
 0xd9b   : > { %p2725_p2 = por %p2724_p0, %p2723_p13 }
 0xd9c   : > { %p2721_p1 = pneg %p2720_p12 }
 0xd9d   : > { %p2727_p4 = por %p2726_p8, %p2725_p2 }
 0xd9f   : > { %p2728_p10 = pnand %p2727_p4, %p2721_p1 }
 0xda1   : > { %2731 = shalt.err (!%p2728_p10)
}
 0xda2   : > { %2313 = dma.vmem_to_hbm [thread:$0]  (%p3631_p9), %s3529_s22, 128, %s3527_s0, %s1862_s3  }
 0xda3 PF: > { %s1926_s19 = sand.u32 1, %s2774_s25   ;;  %p3639_p11 = scmp.ne.s32.totalorder %s3620_s24, 0 }
 0xda4   : > { %p3640_p3 = scmp.ge.s32.totalorder %s2786_s28, 2  ;;  %s1927_s13 = scalar_lea.sflag [#allocation4], %s1926_s19 }
 0xda6   : > { %p2343_p5 = pnand %p3640_p3, %p3639_p11 }
 0xda8   : > { %2765 = dma.done.wait (!%p2343_p5), %s1927_s13, 128  }
 0xda9   : > { %2767 = vsyncadd (!%p2343_p5), %s1927_s13, 4294967168  ;;  %s3641_s11 = sadd.s32 4294967294, %s2786_s28  }
 0xdaa   : > { %s1935_s4 = sand.u32 1, %s3641_s11  }
 0xdab   : > { %s1936_s14 = scalar_lea.sflag [#allocation16], %s1935_s4 }
 0xdac   : > { %2769 = dma.done.wait (!%p2343_p5), %s1936_s14, 192  }
 0xdad   : > { %2771 = vsyncadd (!%p2343_p5), %s1936_s14, 4294967104  ;;  %p33_p9 = scmp.ge.s32.totalorder %s3076_s16, 4   ;;  %s3642_s25 = smov %s2778_s26 }
 0xdae   : > { %s3643_s26 = smov %s2782_s27  ;;  %s3644_s27 = smov %s3087_s10 }
 0xdaf   : > { %s3645_s28 = smov %s3076_s16  ;;  %35 = sbr.rel (!%p33_p9) target bundleno = 21 (0x15), region = 165 }
 0xdb6   :  { %1950 = vsyncpa [#allocation3], 1 }
 0xdb7   :  { %1952 = vsyncpa [#allocation3 + $0x1], 1 }
 0xdb8   :  { %1953 = vsyncpa [#allocation6], 1 }
 0xdb9   :  { %1954 = vsyncpa [#allocation9], 1 }
 0xdba   :  { %1955 = vsyncpa [#allocation12], 1 }
 0xdbb   :  { %1956 = vsyncpa [#allocation4], 1 }
 0xdbc   :  { %1958 = vsyncpa [#allocation4 + $0x1], 1 }
 0xdbd   :  { %1959 = vsyncpa [#allocation16], 1 }
 0xdbe   :  { %1961 = vsyncpa [#allocation16 + $0x1], 1 }

</bundles_post_ra>
